<compile_context>
chip_gen: v7x
topology: tpu7x:2x2x1
jax: 0.10.0
libtpu: 0.0.40
codegen_flags: <defaults>
</compile_context>

<pallas_src>
import functools

import jax
import jax.numpy as jnp
from jax import lax
from jax.experimental import pallas as pl
from jax.experimental.pallas import tpu as pltpu


def _round_up(a, m):
    return ((a + m - 1) // m) * m


def _grid_gated_max2_kernel(x_ref, wa_ref, wg_ref, ba_ref, bg_ref,
                            o_ref, acc_ref, *, ts_total, tile_ts):
    j = pl.program_id(1)

    @pl.when(j == 0)
    def _():
        acc_ref[...] = jnp.full(acc_ref.shape, -jnp.inf, acc_ref.dtype)

    x = x_ref[...]                       # (tile_bt, tile_ts, C)
    tb, tt, C = x.shape
    x2 = x.reshape(tb * tt, C)           # merge leading dims (layout no-op)

    # Linear split into value / gate halves; f32 accumulation on the MXU.
    a = jnp.dot(x2, wa_ref[...], preferred_element_type=jnp.float32,
                precision=lax.Precision.HIGHEST)
    g = jnp.dot(x2, wg_ref[...], preferred_element_type=jnp.float32,
                precision=lax.Precision.HIGHEST)
    a = a + ba_ref[...].astype(jnp.float32)
    g = g + bg_ref[...].astype(jnp.float32)

    # GLU: value * sigmoid(gate)  (exp goes to the EUP slot)
    glu = a * (1.0 / (1.0 + jnp.exp(-g)))      # (tb*tt, C) f32
    glu = glu.reshape(tb, tt, C)

    if ts_total % tile_ts != 0:
        # Mask padded source positions in the last Ts tile (static check).
        ts_idx = j * tile_ts + lax.broadcasted_iota(jnp.int32, (tb, tt, C), 1)
        glu = jnp.where(ts_idx < ts_total, glu, -jnp.inf)

    acc_ref[...] = jnp.maximum(acc_ref[...], jnp.max(glu, axis=1))

    @pl.when(j == pl.num_programs(1) - 1)
    def _():
        o_ref[...] = acc_ref[...].astype(o_ref.dtype)


def grid_gated_max2(x, weight, bias, *, tile_bt=None, tile_ts=None,
                    input_block_budget_bytes=4 * 1024 * 1024):
    """GridGatedMAX2 forward.

    x:      (B, Tt, Ts, C)
    weight: (C, 2*C)   transposed nn.Linear weight, i.e. y = x @ weight + bias
    bias:   (2*C,)
    Returns (out, None) with out of shape (B, Tt, C).
    """
    B, Tt, Ts, C = x.shape
    assert weight.shape == (C, 2 * C)
    assert bias.shape == (2 * C,)

    # Split weight/bias into value / gate halves outside the kernel
    # (avoids in-kernel lane slicing at a non-128-aligned offset for general C).
    w_a, w_g = weight[:, :C], weight[:, C:]
    b_a = bias[:C].reshape(1, C)
    b_g = bias[C:].reshape(1, C)

    BT = B * Tt
    itemsize = jnp.dtype(x.dtype).itemsize
    sub = 16 if itemsize == 2 else (32 if itemsize == 1 else 8)

    # Ts tile (sublane dim of the input block): keep packing-aligned, cap at 128.
    if tile_ts is None:
        tile_ts = min(_round_up(Ts, sub), 128)
    tile_ts = _round_up(tile_ts, sub)

    # BT tile: largest multiple of 8 such that one input block fits the budget
    # (double-buffered this stays well inside v5e's 16 MiB / v7x's 64 MiB VMEM).
    if tile_bt is None:
        fit = max(8, input_block_budget_bytes // (tile_ts * C * itemsize))
        tile_bt = int(min(_round_up(BT, 8), 256, (fit // 8) * 8))
    tile_bt = max(8, (tile_bt // 8) * 8)

    BT_pad = _round_up(BT, tile_bt)
    Ts_pad = _round_up(Ts, tile_ts)

    xf = x.reshape(BT, Ts, C)
    if (BT_pad, Ts_pad) != (BT, Ts):
        xf = jnp.pad(xf, ((0, BT_pad - BT), (0, Ts_pad - Ts), (0, 0)))

    grid = (BT_pad // tile_bt, Ts_pad // tile_ts)

    # Explicit VMEM budget: 2x double-buffered input + weights + resident
    # output/accumulator + headroom.  Capped conservatively for v7x (64 MiB).
    in_bytes = tile_bt * tile_ts * C * itemsize
    w_bytes = 2 * C * C * itemsize
    out_bytes = tile_bt * C * itemsize
    acc_bytes = tile_bt * C * 4
    vmem_limit = int(2 * in_bytes + 2 * w_bytes + 2 * out_bytes + acc_bytes
                     + (8 << 20))
    vmem_limit = min(max(vmem_limit, 16 << 20), 48 << 20)

    flops = 4 * BT * Ts * C * C + 4 * BT * Ts * C
    bytes_accessed = (BT * Ts * C + 2 * C * C + 2 * C + BT * C) * itemsize

    kernel = functools.partial(_grid_gated_max2_kernel,
                               ts_total=Ts, tile_ts=tile_ts)

    out = pl.pallas_call(
        kernel,
        out_shape=jax.ShapeDtypeStruct((BT_pad, C), x.dtype),
        grid_spec=pltpu.PrefetchScalarGridSpec(
            num_scalar_prefetch=0,
            grid=grid,
            in_specs=[
                pl.BlockSpec((tile_bt, tile_ts, C), lambda i, j: (i, j, 0)),
                pl.BlockSpec((C, C), lambda i, j: (0, 0)),   # W_value
                pl.BlockSpec((C, C), lambda i, j: (0, 0)),   # W_gate
                pl.BlockSpec((1, C), lambda i, j: (0, 0)),   # b_value
                pl.BlockSpec((1, C), lambda i, j: (0, 0)),   # b_gate
            ],
            out_specs=pl.BlockSpec((tile_bt, C), lambda i, j: (i, 0)),
            scratch_shapes=[pltpu.VMEM((tile_bt, C), jnp.float32)],
        ),
        compiler_params=pltpu.CompilerParams(
            dimension_semantics=("parallel", "arbitrary"),
            vmem_limit_bytes=vmem_limit,
        ),
        cost_estimate=pl.CostEstimate(
            flops=flops,
            transcendentals=BT * Ts * C,
            bytes_accessed=bytes_accessed,
        ),
    )(xf, w_a.astype(x.dtype), w_g.astype(x.dtype), b_a, b_g)

    out = out[:BT].reshape(B, Tt, C)
    # TODO(synk): need_attention_weights=True branch (normalized histogram of
    # argmax indices over Ts) is not implemented; default forward returns None.
    return out, None


if __name__ == "__main__":
    key = jax.random.PRNGKey(0)
    B, Tt, Ts, C = 2, 8, 16, 128
    kx, kw = jax.random.split(key)
    x = jax.random.normal(kx, (B, Tt, Ts, C), dtype=jnp.float32)

    # Xavier-uniform-like init for the C -> 2C linear, zero bias (as the module).
    limit = (6.0 / (C + 2 * C)) ** 0.5
    weight = jax.random.uniform(kw, (C, 2 * C), dtype=jnp.float32,
                                minval=-limit, maxval=limit)
    bias = jnp.zeros((2 * C,), jnp.float32)

    out, attn = grid_gated_max2(x, weight, bias)
    out = jax.block_until_ready(out)

    # Pure-JAX reference of the PyTorch forward.
    y = jnp.einsum("btsc,cd->btsd", x, weight,
                   precision=lax.Precision.HIGHEST) + bias
    a_ref, g_ref = y[..., :C], y[..., C:]
    ref = jnp.max(a_ref * jax.nn.sigmoid(g_ref), axis=2)

    assert out.shape == (B, Tt, C)
    assert attn is None
    assert jnp.allclose(out, ref, atol=1e-4, rtol=1e-4), \
        float(jnp.max(jnp.abs(out - ref)))

    print("KERNEL_OK")
</pallas_src>

<mosaic_0001>
module attributes {stable_mosaic.version = 11 : i64} {
  func.func @_grid_gated_max2_kernel(%arg0: i32, %arg1: i32, %arg2: memref<16x16x128xf32, #tpu.memory_space<vmem>>, %arg3: memref<128x128xf32, #tpu.memory_space<vmem>>, %arg4: memref<128x128xf32, #tpu.memory_space<vmem>>, %arg5: memref<1x128xf32, #tpu.memory_space<vmem>>, %arg6: memref<1x128xf32, #tpu.memory_space<vmem>>, %arg7: memref<16x128xf32, #tpu.memory_space<vmem>>, %arg8: memref<16x128xf32, #tpu.memory_space<vmem>>) attributes {dimension_semantics = [#tpu.dimension_semantics<parallel>, #tpu.dimension_semantics<arbitrary>], iteration_bounds = array<i64: 1, 1>, scalar_prefetch = 0 : i64, scratch_operands = 1 : i64, tpu.core_type = #tpu.core_type<tc>, window_params = [{transform_indices = @transform_0, window_bounds = array<i64: 16, 16, 128>}, {pipeline_mode = #tpu.pipeline_mode<synchronous>, transform_indices = @transform_1, window_bounds = array<i64: 128, 128>}, {pipeline_mode = #tpu.pipeline_mode<synchronous>, transform_indices = @transform_2, window_bounds = array<i64: 128, 128>}, {pipeline_mode = #tpu.pipeline_mode<synchronous>, transform_indices = @transform_3, window_bounds = array<i64: 1, 128>}, {pipeline_mode = #tpu.pipeline_mode<synchronous>, transform_indices = @transform_4, window_bounds = array<i64: 1, 128>}, {transform_indices = @transform_5, window_bounds = array<i64: 16, 128>}]} {
    %c0_i32 = arith.constant 0 : i32
    %0 = arith.cmpi eq, %arg1, %c0_i32 : i32
    %1 = arith.extui %0 : i1 to i32
    %c0_i32_0 = arith.constant 0 : i32
    %2 = arith.cmpi ne, %1, %c0_i32_0 : i32
    scf.if %2 {
      %cst_22 = arith.constant 0xFF800000 : f32
      %31 = vector.broadcast %cst_22 : f32 to vector<16x128xf32>
      %c0_23 = arith.constant 0 : index
      %c0_24 = arith.constant 0 : index
      %32 = vector.load %arg8[%c0_23, %c0_24] : memref<16x128xf32, #tpu.memory_space<vmem>>, vector<16x128xf32>
      tpu.vector_store %arg8[%c0_23, %c0_24], %31 {strides = array<i32>} : memref<16x128xf32, #tpu.memory_space<vmem>>, vector<16x128xf32>,
    } else {
    }
    %c0 = arith.constant 0 : index
    %c0_1 = arith.constant 0 : index
    %c0_2 = arith.constant 0 : index
    %3 = vector.load %arg2[%c0, %c0_1, %c0_2] : memref<16x16x128xf32, #tpu.memory_space<vmem>>, vector<16x16x128xf32>
    %4 = vector.shape_cast %3 : vector<16x16x128xf32> to vector<256x128xf32>
    %c0_3 = arith.constant 0 : index
    %c0_4 = arith.constant 0 : index
    %5 = vector.load %arg3[%c0_3, %c0_4] : memref<128x128xf32, #tpu.memory_space<vmem>>, vector<128x128xf32>
    %cst = arith.constant dense<0.000000e+00> : vector<256x128xf32>
    %6 = tpu.matmul %4, %5, %cst {dimension_numbers = #tpu.dot_dimension_numbers<[1], [0], [0], [1], [0, 0, 1, 1], [], []>, precision = #tpu.contract_precision<fp32>} : vector<256x128xf32>, vector<128x128xf32>, vector<256x128xf32> -> vector<256x128xf32>
    %c0_5 = arith.constant 0 : index
    %c0_6 = arith.constant 0 : index
    %7 = vector.load %arg4[%c0_5, %c0_6] : memref<128x128xf32, #tpu.memory_space<vmem>>, vector<128x128xf32>
    %cst_7 = arith.constant dense<0.000000e+00> : vector<256x128xf32>
    %8 = tpu.matmul %4, %7, %cst_7 {dimension_numbers = #tpu.dot_dimension_numbers<[1], [0], [0], [1], [0, 0, 1, 1], [], []>, precision = #tpu.contract_precision<fp32>} : vector<256x128xf32>, vector<128x128xf32>, vector<256x128xf32> -> vector<256x128xf32>
    %c0_8 = arith.constant 0 : index
    %c0_9 = arith.constant 0 : index
    %9 = vector.load %arg5[%c0_8, %c0_9] : memref<1x128xf32, #tpu.memory_space<vmem>>, vector<1x128xf32>
    %10 = vector.broadcast %9 : vector<1x128xf32> to vector<256x128xf32>
    %11 = arith.addf %6, %10 : vector<256x128xf32>
    %c0_10 = arith.constant 0 : index
    %c0_11 = arith.constant 0 : index
    %12 = vector.load %arg6[%c0_10, %c0_11] : memref<1x128xf32, #tpu.memory_space<vmem>>, vector<1x128xf32>
    %13 = vector.broadcast %12 : vector<1x128xf32> to vector<256x128xf32>
    %14 = arith.addf %8, %13 : vector<256x128xf32>
    %cst_12 = arith.constant 0.000000e+00 : f32
    %15 = vector.broadcast %cst_12 : f32 to vector<256x128xf32>
    %16 = arith.subf %15, %14 : vector<256x128xf32>
    %17 = math.exp %16 : vector<256x128xf32>
    %cst_13 = arith.constant 1.000000e+00 : f32
    %18 = vector.broadcast %cst_13 : f32 to vector<256x128xf32>
    %19 = arith.addf %18, %17 : vector<256x128xf32>
    %cst_14 = arith.constant 1.000000e+00 : f32
    %20 = vector.broadcast %cst_14 : f32 to vector<256x128xf32>
    %21 = arith.divf %20, %19 : vector<256x128xf32>
    %22 = arith.mulf %11, %21 : vector<256x128xf32>
    %23 = vector.shape_cast %22 : vector<256x128xf32> to vector<16x16x128xf32>
    %c0_15 = arith.constant 0 : index
    %c0_16 = arith.constant 0 : index
    %24 = vector.load %arg8[%c0_15, %c0_16] : memref<16x128xf32, #tpu.memory_space<vmem>>, vector<16x128xf32>
    %cst_17 = arith.constant dense<0xFF800000> : vector<16x128xf32>
    %25 = vector.multi_reduction <maximumf>, %23, %cst_17 [1] : vector<16x16x128xf32> to vector<16x128xf32>
    %26 = arith.maximumf %24, %25 : vector<16x128xf32>
    %c0_18 = arith.constant 0 : index
    %c0_19 = arith.constant 0 : index
    %27 = vector.load %arg8[%c0_18, %c0_19] : memref<16x128xf32, #tpu.memory_space<vmem>>, vector<16x128xf32>
    tpu.vector_store %arg8[%c0_18, %c0_19], %26 {strides = array<i32>} : memref<16x128xf32, #tpu.memory_space<vmem>>, vector<16x128xf32>,
    %c0_i32_20 = arith.constant 0 : i32
    %28 = arith.cmpi eq, %arg1, %c0_i32_20 : i32
    %29 = arith.extui %28 : i1 to i32
    %c0_i32_21 = arith.constant 0 : i32
    %30 = arith.cmpi ne, %29, %c0_i32_21 : i32
    scf.if %30 {
      %c0_22 = arith.constant 0 : index
      %c0_23 = arith.constant 0 : index
      %31 = vector.load %arg8[%c0_22, %c0_23] : memref<16x128xf32, #tpu.memory_space<vmem>>, vector<16x128xf32>
      %c0_24 = arith.constant 0 : index
      %c0_25 = arith.constant 0 : index
      %32 = vector.load %arg7[%c0_24, %c0_25] : memref<16x128xf32, #tpu.memory_space<vmem>>, vector<16x128xf32>
      tpu.vector_store %arg7[%c0_24, %c0_25], %31 {strides = array<i32>} : memref<16x128xf32, #tpu.memory_space<vmem>>, vector<16x128xf32>,
    } else {
    }
    return
  }
  func.func @transform_0(%arg0: i32, %arg1: i32) -> (i32, i32, i32) {
    %c0_i32 = arith.constant 0 : i32
    %c0_i32_0 = arith.constant 0 : i32
    return %arg0, %arg1, %c0_i32 : i32, i32, i32
  }
  func.func @transform_1(%arg0: i32, %arg1: i32) -> (i32, i32) {
    %c0_i32 = arith.constant 0 : i32
    %c0_i32_0 = arith.constant 0 : i32
    %c0_i32_1 = arith.constant 0 : i32
    return %c0_i32, %c0_i32_0 : i32, i32
  }
  func.func @transform_2(%arg0: i32, %arg1: i32) -> (i32, i32) {
    %c0_i32 = arith.constant 0 : i32
    %c0_i32_0 = arith.constant 0 : i32
    %c0_i32_1 = arith.constant 0 : i32
    return %c0_i32, %c0_i32_0 : i32, i32
  }
  func.func @transform_3(%arg0: i32, %arg1: i32) -> (i32, i32) {
    %c0_i32 = arith.constant 0 : i32
    %c0_i32_0 = arith.constant 0 : i32
    %c0_i32_1 = arith.constant 0 : i32
    return %c0_i32, %c0_i32_0 : i32, i32
  }
  func.func @transform_4(%arg0: i32, %arg1: i32) -> (i32, i32) {
    %c0_i32 = arith.constant 0 : i32
    %c0_i32_0 = arith.constant 0 : i32
    %c0_i32_1 = arith.constant 0 : i32
    return %c0_i32, %c0_i32_0 : i32, i32
  }
  func.func @transform_5(%arg0: i32, %arg1: i32) -> (i32, i32) {
    %c0_i32 = arith.constant 0 : i32
    %c0_i32_0 = arith.constant 0 : i32
    return %arg0, %c0_i32 : i32, i32
  }
}

</mosaic_0001>

<bundles_post_ra>
// kernel: tpu_custom_call.1
= control target key start
LH: loop header
LB: loop body
LE: loop exit
PB: predicated region body
PF: predicated region fallthrough
CT: control target
= control target key end

     0   :  { %10 = vsyncpa [#allocation4], 0  ;;  %s8792_s0 = inlined_call_operand.hbm [shape: f32[16,16,128], index: 0, kind: input, shape index: {}]   ;;  %s8793_s1 = inlined_call_operand.hbm [shape: f32[128,128], index: 1, kind: input, shape index: {}]   ;;  %s8794_s2 = inlined_call_operand.hbm [shape: f32[128,128], index: 2, kind: input, shape index: {}]   ;;  %s8795_s3 = inlined_call_operand.vmem [shape: f32[1,128], index: 3, kind: input, shape index: {}]   ;;  %s8796_s4 = inlined_call_operand.vmem [shape: f32[1,128], index: 4, kind: input, shape index: {}]   ;;  %s8797_s5 = inlined_call_operand.hbm [shape: f32[16,128], index: 5, kind: output, shape index: {}]  }
   0x1   :  { %11 = vsyncpa [#allocation7], 0 }
   0x2   :  { %12 = vsyncpa [#allocation5], 0  ;;  %s7034_s18 = smov [#allocation6]   ;;  %s7035_s20 = smov [#allocation3]  }
   0x3   :  { %s30_s19 = sshll.u32 %s7034_s18, 4  ;;  %s18_s21 = sshll.u32 %s7035_s20, 4  ;;  %s31_s19 = int_to_ptr.vmem [resolvable:$true] %s30_s19  ;;  %s7070_s21 = int_to_ptr.vmem [resolvable:$true] %s18_s21 }
   0x4   :  { %s6940_s24 = scalar_lea.hbm %s8793_s1, 2048 }
   0x5   :  { %p6941_p0 = scmp.ne.s32.totalorder %s8793_s1, %s6940_s24  ;;  %p6944_p1 = scmp.lt.u32.totalorder %s6940_s24, %s8793_s1 }
   0x7   :  { %p6946_p2 = pnand %p6944_p1, %p6941_p0 }
   0x9   :  { %6949 = shalt.err (!%p6946_p2)
}
   0xa   :  { %s6950_s29 = scalar_lea.vmem %s31_s19, 2048  ;;  %p6955_p4 = scmp.lt.s32.totalorder %s31_s19, %s31_s19 }
   0xb   :  { %p6951_p3 = scmp.ne.s32.totalorder %s31_s19, %s6950_s29  ;;  %p6956_p5 = scmp.lt.s32.totalorder %s6950_s29, %s6950_s29 }
   0xd   :  { %p6957_p6 = por %p6956_p5, %p6955_p4 }
   0xf   :  { %p6958_p7 = pnand %p6957_p6, %p6951_p3 }
  0x11   :  { %6961 = shalt.err (!%p6958_p7)
}
  0x12   :  { %s7036_s30 = smov 128   ;;  %s7037_s6 = smov 8  }
  0x13   :  { %36 = dma.hbm_to_vmem [thread:$0]  %s8793_s1, 2048, %s31_s19, [#allocation7], %s7036_s30, %s7036_s30, %s7037_s6  }
  0x14   :  { %s6962_s11 = scalar_lea.hbm %s8792_s0, 4096 }
  0x15   :  { %p6963_p8 = scmp.ne.s32.totalorder %s8792_s0, %s6962_s11  ;;  %p6966_p9 = scmp.lt.u32.totalorder %s6962_s11, %s8792_s0 }
  0x17   :  { %p6968_p10 = pnand %p6966_p9, %p6963_p8 }
  0x19   :  { %6971 = shalt.err (!%p6968_p10)
}
  0x1a   :  { %s6972_s16 = scalar_lea.vmem %s7070_s21, 4096  ;;  %p6977_p12 = scmp.lt.s32.totalorder %s7070_s21, %s7070_s21 }
  0x1b   :  { %p6973_p11 = scmp.ne.s32.totalorder %s7070_s21, %s6972_s16  ;;  %p6978_p13 = scmp.lt.s32.totalorder %s6972_s16, %s6972_s16 }
  0x1d   :  { %p6979_p0 = por %p6978_p13, %p6977_p12 }
  0x1f   :  { %p6980_p1 = pnand %p6979_p0, %p6973_p11 }
  0x21   :  { %6983 = shalt.err (!%p6980_p1)
}
  0x22   :  { %24 = dma.hbm_to_vmem [thread:$0]  %s8792_s0, 4096, %s7070_s21, [#allocation4], %s7036_s30, %s7036_s30, %s7037_s6  }
  0x23   :  { %s7038_s18 = smov [#allocation8]   ;;  %s6984_s23 = scalar_lea.hbm %s8794_s2, 2048 }
  0x24   :  { %s42_s19 = sshll.u32 %s7038_s18, 4  ;;  %p6985_p2 = scmp.ne.s32.totalorder %s8794_s2, %s6984_s23  ;;  %s43_s19 = int_to_ptr.vmem [resolvable:$true] %s42_s19 }
  0x25   :  { %p6988_p3 = scmp.lt.u32.totalorder %s6984_s23, %s8794_s2 }
  0x27   :  { %p6990_p4 = pnand %p6988_p3, %p6985_p2 }
  0x29   :  { %6993 = shalt.err (!%p6990_p4)
}
  0x2a   :  { %s6994_s28 = scalar_lea.vmem %s43_s19, 2048  ;;  %p6999_p6 = scmp.lt.s32.totalorder %s43_s19, %s43_s19 }
  0x2b   :  { %p6995_p5 = scmp.ne.s32.totalorder %s43_s19, %s6994_s28  ;;  %p7000_p7 = scmp.lt.s32.totalorder %s6994_s28, %s6994_s28 }
  0x2d   :  { %p7001_p8 = por %p7000_p7, %p6999_p6 }
  0x2f   :  { %p7002_p9 = pnand %p7001_p8, %p6995_p5 }
  0x31   :  { %7005 = shalt.err (!%p7002_p9)
}
  0x32   :  { %48 = dma.hbm_to_vmem [thread:$0]  %s8794_s2, 2048, %s43_s19, [#allocation7], %s7036_s30, %s7036_s30, %s7037_s6  }
  0x33   :  { %7028 = dma.done.wait [#allocation4], 4096  }
  0x34   :  { %7029 = vsyncadd [#allocation4], 4294963200 }
  0x35   :  { %7030 = dma.done.wait [#allocation7], 4096  }
  0x36   :  { %7031 = vsyncadd [#allocation7], 4294963200  ;;  %v7122_v0 = vld [vmem:[#allocation6] sm:$0xff]  ;;  %v7124_v1 = vld [vmem:[#allocation6 + $0x8] sm:$0xff]  ;;  %vm4448_vm0 = vcmask 1041409   ;;  %vm4450_vm1 = vcmask 1042434  }
  0x37   :  { %v7126_v2 = vld [vmem:[#allocation8] sm:$0xff]  ;;  %v8809_v3 = vand.u32 4294901760, %v7122_v0  ;;  %v8808_v4 = vand.u32 4294901760, %v7124_v1  ;;  %v7130_v5 = vld [vmem:[#allocation8 + $0x8] sm:$0xff]  ;;  %v7133_v7 = vld [vmem:[#allocation6 + $0x10] sm:$0xff]  ;;  %vm4452_vm2 = vcmask 1043459  }
  0x38   :  { %v2121_v6 = vand.u32 4294901760, %v7126_v2  ;;  %v7135_v8 = vld [vmem:[#allocation6 + $0x18] sm:$0xff]  ;;  %v2124_v9 = vand.u32 4294901760, %v7130_v5  ;;  %v8803_v10 = vand.u32 4294901760, %v7133_v7  ;;  %v7140_v12 = vld [vmem:[#allocation8 + $0x10] sm:$0xff]  ;;  %v7144_v14 = vld [vmem:[#allocation6 + $0x20] sm:$0xff] }
  0x39   :  { %v8802_v11 = vand.u32 4294901760, %v7135_v8  ;;  %v7142_v13 = vld [vmem:[#allocation8 + $0x18] sm:$0xff]  ;;  %v7150_v15 = vpack.c.bf16 %v8808_v4, %v8809_v3  ;;  %v8821_v16 = vand.u32 4294901760, %v7140_v12  ;;  %v7154_v18 = vld [vmem:[#allocation6 + $0x28] sm:$0xff]  ;;  %v8801_v19 = vand.u32 4294901760, %v7144_v14  ;;  %v7157_v20 = vld [vmem:[#allocation8 + $0x20] sm:$0xff] }
  0x3a   :  { %v8816_v17 = vand.u32 4294901760, %v7142_v13  ;;  %v7159_v21 = vld [vmem:[#allocation8 + $0x28] sm:$0xff]  ;;  %v7165_v22 = vpack.c.bf16 %v2124_v9, %v2121_v6  ;;  %v8800_v24 = vand.u32 4294901760, %v7154_v18  ;;  %v8815_v25 = vand.u32 4294901760, %v7157_v20  ;;  %v7175_v26 = vld [vmem:[#allocation6 + $0x30] sm:$0xff]  ;;  %v7177_v27 = vld [vmem:[#allocation6 + $0x38] sm:$0xff] }
  0x3b   :  { %9083 = vst [vmem:[#allocation13_spill] sm:$0xff] %v7150_v15  ;;  %v7171_v23 = vpack.c.bf16 %v8802_v11, %v8803_v10  ;;  %v7179_v28 = vld [vmem:[#allocation8 + $0x30] sm:$0xff]  ;;  %6039 = vmatprep.subr.bf16.mxu0 %v7150_v15  ;;  %v8814_v30 = vand.u32 4294901760, %v7159_v21  ;;  %v8799_v31 = vand.u32 4294901760, %v7175_v26  ;;  %v8798_v32 = vand.u32 4294901760, %v7177_v27  ;;  %v7191_v33 = vld [vmem:[#allocation8 + $0x38] sm:$0xff] }
  0x3c   :  { %9084 = vst [vmem:[#allocation14_spill] sm:$0xff] %v7165_v22  ;;  %v7186_v29 = vpack.c.bf16 %v8816_v17, %v8821_v16  ;;  %v7193_v34 = vld [vmem:[#allocation6 + $0x40] sm:$0xff]  ;;  %v7195_v35 = vld [vmem:[#allocation6 + $0x48] sm:$0xff]  ;;  %6231 = vmatprep.subr.bf16.mxu1 %v7165_v22  ;;  %6041 = vmatpush3.bf16.msra.mxu0 %v7150_v15  ;;  %v8813_v36 = vand.u32 4294901760, %v7179_v28  ;;  %v8810_v37 = vand.u32 4294901760, %v7191_v33  ;;  %v7206_v41 = vld [vmem:[#allocation6 + $0x50] sm:$0xff]  ;;  %v7214_v42 = vpack.c.bf16 %v8800_v24, %v8801_v19 }
  0x3d   :  { %9085 = vst [vmem:[#allocation15_spill] sm:$0xff] %v7171_v23  ;;  %v8805_v38 = vand.u32 4294901760, %v7193_v34  ;;  %v7202_v39 = vld [vmem:[#allocation8 + $0x40] sm:$0xff]  ;;  %v7204_v40 = vld [vmem:[#allocation8 + $0x48] sm:$0xff]  ;;  %6233 = vmatpush3.bf16.msra.mxu1 %v7165_v22  ;;  %6043 = vmatprep.subr.bf16.mxu0 %v7171_v23  ;;  %v7220_v43 = vpack.c.bf16 %v8814_v30, %v8815_v25  ;;  %v8804_v44 = vand.u32 4294901760, %v7195_v35  ;;  %v7224_v46 = vld [vmem:[#allocation6 + $0x58] sm:$0xff]  ;;  %v7235_v49 = vpack.c.bf16 %v8798_v32, %v8799_v31 }
  0x3e   :  { %9086 = vst [vmem:[#allocation16_spill] sm:$0xff] %v7186_v29  ;;  %9087 = vst [vmem:[#allocation17_spill] sm:$0xff] %v7214_v42  ;;  %v8807_v45 = vand.u32 4294901760, %v7202_v39  ;;  %v7226_v47 = vld [vmem:[#allocation8 + $0x50] sm:$0xff]  ;;  %v7228_v48 = vld [vmem:[#allocation8 + $0x58] sm:$0xff]  ;;  %6235 = vmatprep.subr.bf16.mxu1 %v7186_v29  ;;  %v8806_v50 = vand.u32 4294901760, %v7204_v40  ;;  %v7250_v56 = vpack.c.bf16 %v8810_v37, %v8813_v36 }
  0x3f   :  { %9088 = vst [vmem:[#allocation18_spill] sm:$0xff] %v7220_v43  ;;  %9089 = vst [vmem:[#allocation19_spill] sm:$0xff] %v7235_v49  ;;  %v8812_v51 = vand.u32 4294901760, %v7206_v41  ;;  %v8811_v52 = vand.u32 4294901760, %v7224_v46  ;;  %v7240_v53 = vld [vmem:[#allocation6 + $0x60] sm:$0xff]  ;;  %v7242_v54 = vld [vmem:[#allocation6 + $0x68] sm:$0xff]  ;;  %v7266_v63 = vpack.c.bf16 %v8804_v44, %v8805_v38 }
  0x40   :  { %v7244_v55 = vld [vmem:[#allocation8 + $0x60] sm:$0xff]  ;;  %9090 = vst [vmem:[#allocation20_spill] sm:$0xff] %v7250_v56  ;;  %v8818_v57 = vand.u32 4294901760, %v7226_v47  ;;  %v8817_v58 = vand.u32 4294901760, %v7228_v48  ;;  %v8820_v59 = vand.u32 4294901760, %v7240_v53  ;;  %v7255_v60 = vld [vmem:[#allocation8 + $0x68] sm:$0xff]  ;;  %6045 = vmatpush3.bf16.msra.mxu0 %v7171_v23  ;;  %v7272_v32 = vpack.c.bf16 %v8806_v50, %v8807_v45 }
  0x41   :  { %v7257_v61 = vld [vmem:[#allocation6 + $0x70] sm:$0xff]  ;;  %v7259_v62 = vld [vmem:[#allocation6 + $0x78] sm:$0xff]  ;;  %9091 = vst [vmem:[#allocation21_spill] sm:$0xff] %v7266_v63  ;;  %v8819_v31 = vand.u32 4294901760, %v7242_v54  ;;  %v8823_v24 = vand.u32 4294901760, %v7244_v55  ;;  %v68_v10 = vld [vmem:[#allocation3] sm:$0xff]  ;;  %6237 = vmatpush3.bf16.msra.mxu1 %v7186_v29  ;;  %6047 = vmatprep.subr.bf16.mxu0 %v7214_v42  ;;  %v7286_v44 = vpack.c.bf16 %v8811_v52, %v8812_v51 }
  0x42   :  { %9092 = vst [vmem:[#allocation22_spill] sm:$0xff] %v7272_v32  ;;  %v7276_v19 = vld [vmem:[#allocation8 + $0x70] sm:$0xff]  ;;  %v7278_v11 = vld [vmem:[#allocation8 + $0x78] sm:$0xff]  ;;  %v8822_v38 = vand.u32 4294901760, %v7255_v60  ;;  %v8825_v50 = vand.u32 4294901760, %v7257_v61  ;;  %v8824_v45 = vand.u32 4294901760, %v7259_v62  ;;  %6239 = vmatprep.subr.bf16.mxu1 %v7220_v43  ;;  %v7296_v37 = vpack.c.bf16 %v8817_v58, %v8818_v57 }
  0x43   :  { %9093 = vst [vmem:[#allocation23_spill] sm:$0xff] %v7286_v44  ;;  %v69_v4 = vld [vmem:[#allocation3 + $0x8] sm:$0xff]  ;;  %v70_v3 = vld [vmem:[#allocation3 + $0x10] sm:$0xff]  ;;  %v7302_v52 = vpack.c.bf16 %v8819_v31, %v8820_v59  ;;  %v7305_v36 = vand.u32 4294901760, %v68_v10  ;;  %v71_v30 = vld [vmem:[#allocation3 + $0x18] sm:$0xff]  ;;  %v7319_v31 = vsub.f32 %v7126_v2, %v2121_v6  ;;  %vm4454_vm3 = vcmask 1044484  }
  0x44   :  { %9094 = vst [vmem:[#allocation24_spill] sm:$0xff] %v7296_v37  ;;  %v72_v25 = vld [vmem:[#allocation3 + $0x20] sm:$0xff]  ;;  %v7311_v17 = vpack.c.bf16 %v8822_v38, %v8823_v24  ;;  %v7314_v57 = vand.u32 4294901760, %v69_v4  ;;  %v73_v59 = vld [vmem:[#allocation3 + $0x28] sm:$0xff]  ;;  %6049 = vmatpush3.bf16.msra.mxu0 %v7214_v42  ;;  %v7326_v16 = vpack.c.bf16 %v8824_v45, %v8825_v50  ;;  %v7334_v24 = vsub.f32 %v7130_v5, %v2124_v9  ;;  %v74_v22 = vld [vmem:[#allocation3 + $0x30] sm:$0xff] }
  0x45   :  { %9095 = vst [vmem:[#allocation25_spill] sm:$0xff] %v7302_v52  ;;  %v7329_v38 = vsub.f32 %v68_v10, %v7305_v36  ;;  %v7336_v58 = vand.u32 4294901760, %v70_v3  ;;  %6241 = vmatpush3.bf16.msra.mxu1 %v7220_v43  ;;  %6051 = vmatprep.subr.bf16.mxu0 %v7235_v49  ;;  %v8836_v6 = vand.u32 4294901760, %v7319_v31  ;;  %v7344_v45 = vand.u32 4294901760, %v71_v30 }
  0x46   :  { %9096 = vst [vmem:[#allocation26_spill] sm:$0xff] %v7311_v17  ;;  %9097 = vst [vmem:[#allocation27_spill] sm:$0xff] %v7314_v57  ;;  %v7341_v2 = vsub.f32 %v69_v4, %v7314_v57  ;;  %v7346_v10 = vand.u32 4294901760, %v72_v25  ;;  %6243 = vmatprep.subr.bf16.mxu1 %v7250_v56  ;;  %v8841_v9 = vand.u32 4294901760, %v7334_v24  ;;  %v7356_v51 = vand.u32 4294901760, %v73_v59  ;;  %v81_v57 = vld [vmem:[#allocation3 + $0x68] sm:$0xff] }
  0x47   :  { %9098 = vst [vmem:[#allocation28_spill] sm:$0xff] %v7326_v16  ;;  %9099 = vst [vmem:[#allocation29_spill] sm:$0xff] %v7329_v38  ;;  %v7350_v5 = vand.u32 4294901760, %v7329_v38  ;;  %v7354_v50 = vsub.f32 %v70_v3, %v7336_v58  ;;  %v2525_v42 = vsub.f32 %v7319_v31, %v8836_v6  ;;  %v7365_v43 = vsub.f32 %v71_v30, %v7344_v45 }
  0x48   :  { %9100 = vst [vmem:[#allocation30_spill] sm:$0xff] %v7336_v58  ;;  %9101 = vst [vmem:[#allocation31_spill] sm:$0xff] %v7341_v2  ;;  %v7359_v4 = vand.u32 4294901760, %v7341_v2  ;;  %v7368_v23 = vsub.f32 %v72_v25, %v7346_v10  ;;  %6053 = vmatpush3.bf16.msra.mxu0 %v7235_v49  ;;  %v2532_v29 = vsub.f32 %v7334_v24, %v8841_v9  ;;  %v80_v58 = vld [vmem:[#allocation3 + $0x60] sm:$0xff]  ;;  %vm4456_vm4 = vcmask 1045509  }
  0x49   :  { %9102 = vst [vmem:[#allocation32_spill] sm:$0xff] %v7344_v45  ;;  %9103 = vst [vmem:[#allocation33_spill] sm:$0xff] %v7346_v10  ;;  %v223_v3 = vsub.f32 %v7329_v38, %v7350_v5  ;;  %v7377_v15 = vand.u32 4294901760, %v7354_v50  ;;  %v7380_v6 = vsub.f32 %v73_v59, %v7356_v51  ;;  %6245 = vmatpush3.bf16.msra.mxu1 %v7250_v56  ;;  %6055 = vmatprep.subr.bf16.mxu0 %v7266_v63  ;;  %v76_v10 = vld [vmem:[#allocation3 + $0x40] sm:$0xff]  ;;  %vm4458_vm5 = vcmask 1046534  }
  0x4a   :  { %9104 = vst [vmem:[#allocation34_spill] sm:$0xff] %v7350_v5  ;;  %9105 = vst [vmem:[#allocation35_spill] sm:$0xff] %v7354_v50  ;;  %v233_v25 = vsub.f32 %v7341_v2, %v7359_v4  ;;  %v2526_v30 = vand.u32 4294901760, %v2525_v42  ;;  %v7387_v5 = vand.u32 4294901760, %v7365_v43  ;;  %v7390_v49 = vand.u32 4294901760, %v7368_v23  ;;  %6247 = vmatprep.subr.bf16.mxu1 %v7272_v32 }
  0x4b   :  { %9106 = vst [vmem:[#allocation36_spill] sm:$0xff] %v7356_v51  ;;  %9107 = vst [vmem:[#allocation37_spill] sm:$0xff] %v7359_v4  ;;  %v224_v9 = vand.u32 4294901760, %v223_v3  ;;  %v2533_v38 = vand.u32 4294901760, %v2532_v29  ;;  %v243_v59 = vsub.f32 %v7354_v50, %v7377_v15  ;;  %v7396_v56 = vand.u32 4294901760, %v7380_v6  ;;  %v75_v50 = vld [vmem:[#allocation3 + $0x38] sm:$0xff] }
  0x4c   :  { %9108 = vst [vmem:[#allocation38_spill] sm:$0xff] %v7365_v43  ;;  %9109 = vst [vmem:[#allocation39_spill] sm:$0xff] %v7368_v23  ;;  %v9115_v4 = vand.u32 4294901760, %v7276_v19  ;;  %v9116_v42 = vand.u32 4294901760, %v7278_v11  ;;  %v253_v51 = vsub.f32 %v7365_v43, %v7387_v5  ;;  %v263_v3 = vsub.f32 %v7368_v23, %v7390_v49  ;;  %6057 = vmatpush3.bf16.msra.mxu0 %v7266_v63  ;;  %v77_v23 = vld [vmem:[#allocation3 + $0x48] sm:$0xff] }
  0x4d   :  { %9110 = vst [vmem:[#allocation40_spill] sm:$0xff] %v7377_v15  ;;  %9111 = vst [vmem:[#allocation41_spill] sm:$0xff] %v7380_v6  ;;  %v9118_v29 = vand.u32 4294901760, %v7140_v12  ;;  %5110 = vmatprep.mubr.f32.mxu0 %v224_v9  ;;  %v7414_v45 = vand.u32 4294901760, %v233_v25  ;;  %6249 = vmatpush3.bf16.msra.mxu1 %v7272_v32  ;;  %v273_v25 = vsub.f32 %v7380_v6, %v7396_v56  ;;  %v7448_v63 = vand.u32 4294901760, %v77_v23 }
  0x4e   :  { %9112 = vst [vmem:[#allocation42_spill] sm:$0xff] %v7387_v5  ;;  %9113 = vst [vmem:[#allocation43_spill] sm:$0xff] %v7390_v49  ;;  %v7402_v2 = vpack.c.bf16 %v9116_v42, %v9115_v4  ;;  %v7416_v4 = vpack.c.bf16 %v2533_v38, %v2526_v30  ;;  %v7418_v42 = vand.u32 4294901760, %v243_v59  ;;  %v9119_v5 = vand.u32 4294901760, %v7142_v13  ;;  %6059 = vmatprep.subr.bf16.mxu0 %v7286_v44 }
  0x4f   :  { %9114 = vst [vmem:[#allocation44_spill] sm:$0xff] %v7396_v56  ;;  %v7411_v15 = vsub.f32 %v7140_v12, %v9118_v29  ;;  %v7427_v12 = vand.u32 4294901760, %v253_v51  ;;  %v7432_v30 = vand.u32 4294901760, %v74_v22  ;;  %6251 = vmatprep.subr.bf16.mxu1 %v7296_v37  ;;  %5590 = vmatprep.mubr.f32.mxu1 %v224_v9  ;;  %v7435_v59 = vand.u32 4294901760, %v263_v3  ;;  %9124 = vst [vmem:[#allocation50_spill] sm:$0xff] %v7448_v63 }
  0x50   :  { %9117 = vst [vmem:[#allocation45_spill] sm:$0xff] %v7402_v2  ;;  %v7423_v49 = vsub.f32 %v7142_v13, %v9119_v5  ;;  %v7438_v5 = vand.u32 4294901760, %v75_v50  ;;  %v7440_v29 = vand.u32 4294901760, %v76_v10  ;;  %v9125_v32 = vand.u32 4294901760, %v7157_v20  ;;  %6061 = vmatpush3.bf16.msra.mxu0 %v7286_v44 }
  0x51   :  { %v8876_v38 = vand.u32 4294901760, %v7411_v15  ;;  %9120 = vst [vmem:[#allocation46_spill] sm:$0xff] %v7432_v30  ;;  %v7446_v56 = vsub.f32 %v74_v22, %v7432_v30  ;;  %v9128_v22 = vand.u32 4294901760, %v7159_v21  ;;  %v78_v30 = vld [vmem:[#allocation3 + $0x50] sm:$0xff]  ;;  %6253 = vmatpush3.bf16.msra.mxu1 %v7296_v37  ;;  %6063 = vmatprep.subr.bf16.mxu0 %v7302_v52  ;;  %vm4460_vm6 = vcmask 1047559  }
  0x52   :  { %v8881_v13 = vand.u32 4294901760, %v7423_v49  ;;  %9121 = vst [vmem:[#allocation47_spill] sm:$0xff] %v7438_v5  ;;  %9122 = vst [vmem:[#allocation48_spill] sm:$0xff] %v7440_v29  ;;  %v7453_v9 = vsub.f32 %v7157_v20, %v9125_v32  ;;  %v7460_v6 = vsub.f32 %v75_v50, %v7438_v5  ;;  %v7476_v50 = vsub.f32 %v77_v23, %v7448_v63 }
  0x53   :  { %v2539_v51 = vsub.f32 %v7411_v15, %v8876_v38  ;;  %9123 = vst [vmem:[#allocation49_spill] sm:$0xff] %v7446_v56  ;;  %v7463_v38 = vsub.f32 %v76_v10, %v7440_v29  ;;  %v7468_v43 = vsub.f32 %v7159_v21, %v9128_v22  ;;  %v7473_v32 = vand.u32 4294901760, %v7446_v56  ;;  %6255 = vmatprep.subr.bf16.mxu1 %v7311_v17 }
  0x54   :  { %v2546_v3 = vsub.f32 %v7423_v49, %v8881_v13  ;;  %9126 = vst [vmem:[#allocation51_spill] sm:$0xff] %v7460_v6  ;;  %9131 = vst [vmem:[#allocation55_spill] sm:$0xff] %v7476_v50  ;;  %v8900_v10 = vand.u32 4294901760, %v7453_v9  ;;  %v7481_v21 = vand.u32 4294901760, %v7460_v6  ;;  %v7490_v37 = vand.u32 4294901760, %v7476_v50  ;;  %6065 = vmatpush3.bf16.msra.mxu0 %v7302_v52 }
  0x55   :  { %9127 = vst [vmem:[#allocation52_spill] sm:$0xff] %v7463_v38  ;;  %9129 = vst [vmem:[#allocation53_spill] sm:$0xff] %v7468_v43  ;;  %v2540_v20 = vand.u32 4294901760, %v2539_v51  ;;  %v7484_v22 = vand.u32 4294901760, %v7463_v38  ;;  %v283_v51 = vsub.f32 %v7446_v56, %v7473_v32  ;;  %v7495_v63 = vand.u32 4294901760, %v78_v30  ;;  %6257 = vmatpush3.bf16.msra.mxu1 %v7311_v17  ;;  %6067 = vmatprep.subr.bf16.mxu0 %v7326_v16 }
  0x56   :  { %9130 = vst [vmem:[#allocation54_spill] sm:$0xff] %v7473_v32  ;;  %v2547_v13 = vand.u32 4294901760, %v2546_v3  ;;  %9132 = vst [vmem:[#allocation56_spill] sm:$0xff] %v7481_v21  ;;  %v2553_v23 = vsub.f32 %v7453_v9, %v8900_v10  ;;  %v79_v3 = vld [vmem:[#allocation3 + $0x58] sm:$0xff]  ;;  %v7498_v29 = vand.u32 4294901760, %v273_v25  ;;  %v293_v44 = vsub.f32 %v7460_v6, %v7481_v21  ;;  %6259 = vmatprep.subr.bf16.mxu1 %v7402_v2  ;;  %v82_v6 = vld [vmem:[#allocation3 + $0x70] sm:$0xff] }
  0x57   :  { %9133 = vst [vmem:[#allocation57_spill] sm:$0xff] %v7484_v22  ;;  %9134 = vst [vmem:[#allocation58_spill] sm:$0xff] %v7490_v37  ;;  %v303_v32 = vsub.f32 %v7463_v38, %v7484_v22  ;;  %v9136_v56 = vand.u32 4294901760, %v7468_v43  ;;  %v7511_v25 = vand.u32 4294901760, %v283_v51  ;;  %v313_v21 = vsub.f32 %v7476_v50, %v7490_v37 }
  0x58   :  { %9135 = vst [vmem:[#allocation59_spill] sm:$0xff] %v7495_v63  ;;  %v7509_v10 = vpack.c.bf16 %v2547_v13, %v2540_v20  ;;  %v7516_v52 = vsub.f32 %v78_v30, %v7495_v63  ;;  %v7519_v22 = vand.u32 4294901760, %v293_v44  ;;  %v2554_v38 = vand.u32 4294901760, %v2553_v23  ;;  %v83_v30 = vld [vmem:[#allocation3 + $0x78] sm:$0xff]  ;;  %6069 = vmatpush3.bf16.msra.mxu0 %v7326_v16 }
  0x59   :  { %v2560_v5 = vsub.f32 %v7468_v43, %v9136_v56  ;;  %v7521_v56 = vand.u32 4294901760, %v303_v32  ;;  %v7523_v17 = vand.u32 4294901760, %v79_v3  ;;  %v7528_v51 = vand.u32 4294901760, %v80_v58  ;;  %6261 = vmatpush3.bf16.msra.mxu1 %v7402_v2 }
  0x5a   :  { %9137 = vst [vmem:[#allocation60_spill] sm:$0xff] %v7516_v52  ;;  %v7526_v20 = vand.u32 4294901760, %v7516_v52  ;;  %v7530_v37 = vand.u32 4294901760, %v81_v57  ;;  %v7533_v50 = vand.u32 4294901760, %v313_v21  ;;  %v9143_v32 = vand.u32 4294901760, %v7179_v28  ;;  %6263 = vmatprep.subr.bf16.mxu1 %v7416_v4 }
  0x5b   :  { %9138 = vst [vmem:[#allocation61_spill] sm:$0xff] %v7523_v17  ;;  %v2561_v13 = vand.u32 4294901760, %v2560_v5  ;;  %9140 = vst [vmem:[#allocation63_spill] sm:$0xff] %v7528_v51  ;;  %v7536_v44 = vsub.f32 %v79_v3, %v7523_v17  ;;  %v9144_v5 = vand.u32 4294901760, %v7191_v33  ;;  %v7552_v21 = vsub.f32 %v80_v58, %v7528_v51  ;;  %5111 = vmatmul.mubr.f32.vlgmr.msra.gmra.mrb[0].mxu0 %v7414_v45 }
  0x5c   :  { %9139 = vst [vmem:[#allocation62_spill] sm:$0xff] %v7526_v20  ;;  %9141 = vst [vmem:[#allocation64_spill] sm:$0xff] %v7530_v37  ;;  %v7541_v23 = vsub.f32 %v7179_v28, %v9143_v32  ;;  %v323_v16 = vsub.f32 %v7516_v52, %v7526_v20  ;;  %v7555_v3 = vsub.f32 %v81_v57, %v7530_v37  ;;  %v7557_v17 = vand.u32 4294901760, %v82_v6  ;;  %v84_v28 = vld [vmem:[#allocation3 + $0x80] sm:$0xff] }
  0x5d   :  { %9142 = vst [vmem:[#allocation65_spill] sm:$0xff] %v7536_v44  ;;  %v7546_v63 = vsub.f32 %v7191_v33, %v9144_v5  ;;  %9145 = vst [vmem:[#allocation66_spill] sm:$0xff] %v7552_v21  ;;  %v7561_v32 = vand.u32 4294901760, %v7536_v44  ;;  %v7565_v2 = vand.u32 4294901760, %v83_v30  ;;  %v6270_v58 = vpack.c.bf16 %v2561_v13, %v2554_v38  ;;  %5591 = vmatmul.mubr.f32.vlgmr.msra.gmra.mrb[0].mxu1 %v7414_v45 }
  0x5e   :  { %9146 = vst [vmem:[#allocation67_spill] sm:$0xff] %v7555_v3  ;;  %9147 = vst [vmem:[#allocation68_spill] sm:$0xff] %v7557_v17  ;;  %v8935_v33 = vand.u32 4294901760, %v7541_v23  ;;  %v7569_v57 = vand.u32 4294901760, %v7552_v21  ;;  %v7572_v20 = vand.u32 4294901760, %v7555_v3  ;;  %v7575_v52 = vsub.f32 %v82_v6, %v7557_v17  ;;  %5113 = vmatprep.mubr.f32.mxu0 %v7418_v42  ;;  %6265 = vmatpush3.bf16.msra.mxu1 %v7416_v4 }
  0x5f   :  { %9148 = vst [vmem:[#allocation69_spill] sm:$0xff] %v7561_v32  ;;  %9149 = vst [vmem:[#allocation70_spill] sm:$0xff] %v7565_v2  ;;  %v333_v5 = vsub.f32 %v7536_v44, %v7561_v32  ;;  %v9153_v13 = vand.u32 4294901760, %v7546_v63  ;;  %v7587_v51 = vand.u32 4294901760, %v84_v28  ;;  %5593 = vmatprep.mubr.f32.mxu1 %v7418_v42  ;;  %6267 = vmatprep.subr.bf16.mxu1 %v7509_v10  ;;  %v9157_v42 = vand.u32 4294901760, %v7122_v0 }
  0x60   :  { %9150 = vst [vmem:[#allocation71_spill] sm:$0xff] %v7569_v57  ;;  %9151 = vst [vmem:[#allocation72_spill] sm:$0xff] %v7572_v20  ;;  %v2567_v38 = vsub.f32 %v7541_v23, %v8935_v33  ;;  %v343_v45 = vsub.f32 %v7552_v21, %v7569_v57  ;;  %v353_v6 = vsub.f32 %v7555_v3, %v7572_v20  ;;  %v7596_v32 = vand.u32 4294901760, %v7575_v52  ;;  %v85_v57 = vld [vmem:[#allocation3 + $0x88] sm:$0xff] }
  0x61   :  { %9152 = vst [vmem:[#allocation73_spill] sm:$0xff] %v7575_v52  ;;  %v2574_v37 = vsub.f32 %v7546_v63, %v9153_v13  ;;  %9154 = vst [vmem:[#allocation74_spill] sm:$0xff] %v7587_v51  ;;  %v7599_v33 = vsub.f32 %v83_v30, %v7565_v2  ;;  %v7602_v13 = vand.u32 4294901760, %v323_v16  ;;  %v7607_v17 = vsub.f32 %v7122_v0, %v9157_v42  ;;  %v86_v42 = vld [vmem:[#allocation3 + $0x90] sm:$0xff] }
  0x62   :  { %9155 = vst [vmem:[#allocation75_spill] sm:$0xff] %v7596_v32  ;;  %v2568_v44 = vand.u32 4294901760, %v2567_v38  ;;  %5114 = vmatmul.mubr.f32.gmra.mrb[2].mxu0 %v7427_v12  ;;  %v7610_v20 = vand.u32 4294901760, %v333_v5  ;;  %v7612_v3 = vand.u32 4294901760, %v343_v45  ;;  %v363_v30 = vsub.f32 %v7575_v52, %v7596_v32  ;;  %5594 = vmatmul.mubr.f32.gmra.mrb[2].mxu1 %v7427_v12 }
  0x63   :  { %9156 = vst [vmem:[#allocation76_spill] sm:$0xff] %v7599_v33  ;;  %v2575_v4 = vand.u32 4294901760, %v2574_v37  ;;  %v7617_v16 = vand.u32 4294901760, %v7599_v33  ;;  %5116 = vmatprep.mubr.f32.mxu0 %v7435_v59  ;;  %v7621_v37 = vand.u32 4294901760, %v353_v6  ;;  %v9159_v38 = vand.u32 4294901760, %v7124_v1  ;;  %5596 = vmatprep.mubr.f32.mxu1 %v7435_v59 }
  0x64   :  { %v7630_v45 = vsub.f32 %v84_v28, %v7587_v51  ;;  %6269 = vmatpush3.bf16.msra.mxu1 %v7509_v10  ;;  %v7636_v32 = vand.u32 4294901760, %v85_v57  ;;  %v9162_v0 = vand.u32 4294901760, %v7202_v39  ;;  %v9175_v51 = vand.u32 4294901760, %v7135_v8 }
  0x65   :  { %9158 = vst [vmem:[#allocation77_spill] sm:$0xff] %v7617_v16  ;;  %v7627_v5 = vsub.f32 %v7124_v1, %v9159_v38  ;;  %v6274_v12 = vpack.c.bf16 %v2575_v4, %v2568_v44  ;;  %v373_v6 = vsub.f32 %v7599_v33, %v7617_v16  ;;  %6271 = vmatprep.subr.bf16.mxu1 %v6270_v58  ;;  %v9163_v1 = vand.u32 4294901760, %v7607_v17  ;;  %v87_v38 = vld [vmem:[#allocation3 + $0x98] sm:$0xff] }
  0x66   :  { %9160 = vst [vmem:[#allocation78_spill] sm:$0xff] %v7630_v45  ;;  %9161 = vst [vmem:[#allocation79_spill] sm:$0xff] %v7636_v32  ;;  %v7641_v52 = vsub.f32 %v7202_v39, %v9162_v0  ;;  %v7648_v10 = vand.u32 4294901760, %v7630_v45  ;;  %v9165_v44 = vand.u32 4294901760, %v7204_v40  ;;  %5117 = vmatmul.mubr.f32.gmra.mrb[4].mxu0 %v7498_v29  ;;  %v7656_v39 = vand.u32 4294901760, %v363_v30  ;;  %5597 = vmatmul.mubr.f32.gmra.mrb[4].mxu1 %v7498_v29 }
  0x67   :  { %v544_v28 = vsub.f32 %v7607_v17, %v9163_v1  ;;  %v7659_v0 = vsub.f32 %v85_v57, %v7636_v32  ;;  %v7662_v16 = vand.u32 4294901760, %v86_v42  ;;  %5119 = vmatprep.mubr.f32.mxu0 %v7511_v25  ;;  %5599 = vmatprep.mubr.f32.mxu1 %v7511_v25  ;;  %v7682_v21 = vand.u32 4294901760, %v87_v38  ;;  %v88_v32 = vld [vmem:[#allocation3 + $0xa0] sm:$0xff] }
  0x68   :  { %9164 = vst [vmem:[#allocation80_spill] sm:$0xff] %v7648_v10  ;;  %v7653_v4 = vsub.f32 %v7204_v40, %v9165_v44  ;;  %v8962_v1 = vand.u32 4294901760, %v7641_v52  ;;  %v9168_v40 = vand.u32 4294901760, %v7627_v5  ;;  %v383_v30 = vsub.f32 %v7630_v45, %v7648_v10  ;;  %6273 = vmatpush3.bf16.msra.mxu1 %v6270_v58 }
  0x69   :  { %9166 = vst [vmem:[#allocation81_spill] sm:$0xff] %v7659_v0  ;;  %9167 = vst [vmem:[#allocation82_spill] sm:$0xff] %v7662_v16  ;;  %v545_v59 = vand.u32 4294901760, %v544_v28  ;;  %v7674_v57 = vand.u32 4294901760, %v7659_v0  ;;  %v7680_v28 = vsub.f32 %v86_v42, %v7662_v16  ;;  %6275 = vmatprep.subr.bf16.mxu1 %v6274_v12  ;;  %v9172_v58 = vand.u32 4294901760, %v7133_v7  ;;  %v89_v16 = vld [vmem:[#allocation3 + $0xa8] sm:$0xff] }
  0x6a   :  { %v551_v44 = vsub.f32 %v7627_v5, %v9168_v40  ;;  %v8965_v33 = vand.u32 4294901760, %v7653_v4  ;;  %v2581_v29 = vsub.f32 %v7641_v52, %v8962_v1  ;;  %9171 = vst [vmem:[#allocation85_spill] sm:$0xff] %v7682_v21  ;;  %v7684_v40 = vand.u32 4294901760, %v373_v6  ;;  %5120 = vmatmul.mubr.f32.gmra.mrb[6].mxu0 %v7519_v22  ;;  %5600 = vmatmul.mubr.f32.gmra.mrb[6].mxu1 %v7519_v22 }
  0x6b   :  { %9169 = vst [vmem:[#allocation83_spill] sm:$0xff] %v7674_v57  ;;  %9170 = vst [vmem:[#allocation84_spill] sm:$0xff] %v7680_v28  ;;  %v7692_v45 = vsub.f32 %v7133_v7, %v9172_v58  ;;  %v393_v42 = vsub.f32 %v7659_v0, %v7674_v57  ;;  %v7698_v6 = vand.u32 4294901760, %v7680_v28  ;;  %5122 = vmatprep.mubr.f32.mxu0 %v7521_v56  ;;  %5602 = vmatprep.mubr.f32.mxu1 %v7521_v56 }
  0x6c   :  { %v552_v10 = vand.u32 4294901760, %v551_v44  ;;  %v2588_v25 = vsub.f32 %v7653_v4, %v8965_v33  ;;  %v2582_v1 = vand.u32 4294901760, %v2581_v29  ;;  %v7701_v44 = vsub.f32 %v87_v38, %v7682_v21  ;;  %6277 = vmatpush3.bf16.msra.mxu1 %v6274_v12 }
  0x6d   :  { %9173 = vst [vmem:[#allocation86_spill] sm:$0xff] %v7698_v6  ;;  %v8970_v33 = vand.u32 4294901760, %v7692_v45  ;;  %v7709_v57 = vsub.f32 %v7135_v8, %v9175_v51  ;;  %v7712_v29 = vand.u32 4294901760, %v383_v30  ;;  %v403_v38 = vsub.f32 %v7680_v28, %v7698_v6 }
  0x6e   :  { %9174 = vst [vmem:[#allocation87_spill] sm:$0xff] %v7701_v44  ;;  %v6070_v7 = vpack.c.bf16 %v552_v10, %v545_v59  ;;  %v2589_v58 = vand.u32 4294901760, %v2588_v25  ;;  %v7717_v22 = vand.u32 4294901760, %v7701_v44  ;;  %v7719_v59 = vand.u32 4294901760, %v88_v32  ;;  %5123 = vmatmul.mubr.f32.gmra.mrb[8].mxu0 %v7533_v50  ;;  %5603 = vmatmul.mubr.f32.gmra.mrb[8].mxu1 %v7533_v50 }
  0x6f   :  { %v558_v8 = vsub.f32 %v7692_v45, %v8970_v33  ;;  %v8977_v51 = vand.u32 4294901760, %v7709_v57  ;;  %v7725_v56 = vand.u32 4294901760, %v89_v16  ;;  %v7728_v12 = vand.u32 4294901760, %v393_v42  ;;  %5125 = vmatprep.mubr.f32.mxu0 %v7602_v13  ;;  %5605 = vmatprep.mubr.f32.mxu1 %v7602_v13  ;;  %v91_v13 = vld [vmem:[#allocation3 + $0xb8] sm:$0xff] }
  0x70   :  { %9176 = vst [vmem:[#allocation88_spill] sm:$0xff] %v7717_v22  ;;  %9177 = vst [vmem:[#allocation89_spill] sm:$0xff] %v7719_v59  ;;  %6071 = vmatprep.subr.bf16.mxu0 %v6070_v7  ;;  %v6278_v10 = vpack.c.bf16 %v2589_v58, %v2582_v1  ;;  %v413_v30 = vsub.f32 %v7701_v44, %v7717_v22  ;;  %v7733_v25 = vsub.f32 %v88_v32, %v7719_v59  ;;  %v90_v44 = vld [vmem:[#allocation3 + $0xb0] sm:$0xff] }
  0x71   :  { %9178 = vst [vmem:[#allocation90_spill] sm:$0xff] %v7725_v56  ;;  %v9180_v1 = vand.u32 4294901760, %v7144_v14  ;;  %v559_v33 = vand.u32 4294901760, %v558_v8  ;;  %v565_v42 = vsub.f32 %v7709_v57, %v8977_v51  ;;  %v7746_v6 = vsub.f32 %v89_v16, %v7725_v56  ;;  %6073 = vmatpush3.bf16.msra.mxu0 %v6070_v7 }
  0x72   :  { %9179 = vst [vmem:[#allocation91_spill] sm:$0xff] %v7733_v25  ;;  %v9182_v32 = vand.u32 4294901760, %v7154_v18  ;;  %v7757_v50 = vand.u32 4294901760, %v7733_v25  ;;  %6279 = vmatprep.subr.bf16.mxu1 %v6278_v10  ;;  %v9186_v7 = vand.u32 4294901760, %v7228_v48  ;;  %5126 = vmatmul.mubr.f32.gmra.mrb[10].mxu0 %v7610_v20  ;;  %v7805_v0 = vand.u32 4294901760, %v91_v13 }
  0x73   :  { %v7738_v58 = vsub.f32 %v7144_v14, %v9180_v1  ;;  %9181 = vst [vmem:[#allocation92_spill] sm:$0xff] %v7746_v6  ;;  %v7754_v14 = vand.u32 4294901760, %v403_v38  ;;  %v9184_v1 = vand.u32 4294901760, %v7226_v47  ;;  %v566_v51 = vand.u32 4294901760, %v565_v42  ;;  %6281 = vmatpush3.bf16.msra.mxu1 %v6278_v10  ;;  %5128 = vmatprep.mubr.f32.mxu0 %v7612_v3 }
  0x74   :  { %v7751_v22 = vsub.f32 %v7154_v18, %v9182_v32  ;;  %9183 = vst [vmem:[#allocation93_spill] sm:$0xff] %v7757_v50  ;;  %v7766_v18 = vand.u32 4294901760, %v7746_v6  ;;  %v7772_v38 = vsub.f32 %v7228_v48, %v9186_v7  ;;  %v423_v32 = vsub.f32 %v7733_v25, %v7757_v50  ;;  %5606 = vmatmul.mubr.f32.gmra.mrb[10].mxu1 %v7610_v20 }
  0x75   :  { %v8982_v8 = vand.u32 4294901760, %v7738_v58  ;;  %v7763_v16 = vsub.f32 %v7226_v47, %v9184_v1  ;;  %v7781_v1 = vand.u32 4294901760, %v90_v44  ;;  %v7785_v48 = vand.u32 4294901760, %v413_v30  ;;  %5608 = vmatprep.mubr.f32.mxu1 %v7612_v3  ;;  %9191 = vst [vmem:[#allocation97_spill] sm:$0xff] %v7805_v0 }
  0x76   :  { %9185 = vst [vmem:[#allocation94_spill] sm:$0xff] %v7766_v18  ;;  %v6074_v7 = vpack.c.bf16 %v566_v51, %v559_v33  ;;  %v9188_v10 = vand.u32 4294901760, %v7751_v22  ;;  %v8991_v25 = vand.u32 4294901760, %v7772_v38  ;;  %v92_v33 = vld [vmem:[#allocation3 + $0xc0] sm:$0xff]  ;;  %v7800_v51 = vand.u32 4294901760, %v423_v32  ;;  %5129 = vmatmul.mubr.f32.gmra.mrb[12].mxu0 %v7621_v37 }
  0x77   :  { %v572_v47 = vsub.f32 %v7738_v58, %v8982_v8  ;;  %9187 = vst [vmem:[#allocation95_spill] sm:$0xff] %v7781_v1  ;;  %v433_v8 = vsub.f32 %v7746_v6, %v7766_v18  ;;  %v9189_v28 = vand.u32 4294901760, %v7763_v16  ;;  %v7798_v30 = vsub.f32 %v90_v44, %v7781_v1  ;;  %v93_v18 = vld [vmem:[#allocation3 + $0xc8] sm:$0xff]  ;;  %5131 = vmatprep.mubr.f32.mxu0 %v7656_v39 }
  0x78   :  { %v579_v50 = vsub.f32 %v7751_v22, %v9188_v10  ;;  %6075 = vmatprep.subr.bf16.mxu0 %v6074_v7  ;;  %v2602_v3 = vsub.f32 %v7772_v38, %v8991_v25  ;;  %v9193_v44 = vand.u32 4294901760, %v7175_v26  ;;  %5609 = vmatmul.mubr.f32.gmra.mrb[12].mxu1 %v7621_v37  ;;  %v7826_v56 = vand.u32 4294901760, %v92_v33 }
  0x79   :  { %v573_v42 = vand.u32 4294901760, %v572_v47  ;;  %v2595_v20 = vsub.f32 %v7763_v16, %v9189_v28  ;;  %9190 = vst [vmem:[#allocation96_spill] sm:$0xff] %v7798_v30  ;;  %v7809_v28 = vand.u32 4294901760, %v7798_v30  ;;  %5611 = vmatprep.mubr.f32.mxu1 %v7656_v39  ;;  %6077 = vmatpush3.bf16.msra.mxu0 %v6074_v7  ;;  %v7833_v37 = vand.u32 4294901760, %v93_v18 }
  0x7a   :  { %v580_v10 = vand.u32 4294901760, %v579_v50  ;;  %v7814_v6 = vsub.f32 %v7175_v26, %v9193_v44  ;;  %v9194_v50 = vand.u32 4294901760, %v7177_v27  ;;  %v2603_v1 = vand.u32 4294901760, %v2602_v3  ;;  %9196 = vst [vmem:[#allocation100_spill] sm:$0xff] %v7826_v56  ;;  %5132 = vmatmul.mubr.f32.gmra.mrb[14].mxu0 %v7684_v40 }
  0x7b   :  { %v2596_v47 = vand.u32 4294901760, %v2595_v20  ;;  %9192 = vst [vmem:[#allocation98_spill] sm:$0xff] %v7809_v28  ;;  %v7824_v20 = vsub.f32 %v91_v13, %v7805_v0  ;;  %v443_v26 = vsub.f32 %v7798_v30, %v7809_v28  ;;  %9197 = vst [vmem:[#allocation101_spill] sm:$0xff] %v7833_v37  ;;  %v7839_v13 = vsub.f32 %v92_v33, %v7826_v56 }
  0x7c   :  { %v7819_v32 = vsub.f32 %v7177_v27, %v9194_v50  ;;  %v6078_v25 = vpack.c.bf16 %v580_v10, %v573_v42  ;;  %v8996_v27 = vand.u32 4294901760, %v7814_v6  ;;  %v9200_v39 = vand.u32 4294901760, %v7193_v34  ;;  %5612 = vmatmul.mubr.f32.gmra.mrb[14].mxu1 %v7684_v40  ;;  %5134 = vmatprep.mubr.f32.mxu0 %v7712_v29 }
  0x7d   :  { %9195 = vst [vmem:[#allocation99_spill] sm:$0xff] %v7824_v20  ;;  %v6282_v42 = vpack.c.bf16 %v2603_v1, %v2596_v47  ;;  %v7836_v10 = vand.u32 4294901760, %v7824_v20  ;;  %9199 = vst [vmem:[#allocation103_spill] sm:$0xff] %v7839_v13  ;;  %v7847_v3 = vand.u32 4294901760, %v433_v8  ;;  %v7856_v33 = vsub.f32 %v93_v18, %v7833_v37  ;;  %5614 = vmatprep.mubr.f32.mxu1 %v7712_v29 }
  0x7e   :  { %v8997_v44 = vand.u32 4294901760, %v7819_v32  ;;  %6079 = vmatprep.subr.bf16.mxu0 %v6078_v25  ;;  %v7844_v7 = vsub.f32 %v7193_v34, %v9200_v39  ;;  %v586_v50 = vsub.f32 %v7814_v6, %v8996_v27  ;;  %v7863_v8 = vand.u32 4294901760, %v7839_v13  ;;  %5135 = vmatmul.mubr.f32.gmra.mrb[16].mxu0 %v7728_v12 }
  0x7f   :  { %9198 = vst [vmem:[#allocation102_spill] sm:$0xff] %v7836_v10  ;;  %9201 = vst [vmem:[#allocation104_spill] sm:$0xff] %v7856_v33  ;;  %v453_v34 = vsub.f32 %v7824_v20, %v7836_v10  ;;  %v9203_v39 = vand.u32 4294901760, %v7195_v35  ;;  %6283 = vmatprep.subr.bf16.mxu1 %v6282_v42  ;;  %v9205_v10 = vand.u32 4294901760, %v7244_v55  ;;  %v94_v20 = vld [vmem:[#allocation3 + $0xd0] sm:$0xff]  ;;  %6081 = vmatpush3.bf16.msra.mxu0 %v6078_v25  ;;  %v444_v47 = vand.u32 4294901760, %v443_v26 }
  0x80   :  { %v593_v1 = vsub.f32 %v7819_v32, %v8997_v44  ;;  %9202 = vst [vmem:[#allocation105_spill] sm:$0xff] %v7863_v8  ;;  %v587_v18 = vand.u32 4294901760, %v586_v50  ;;  %v7873_v44 = vand.u32 4294901760, %v7856_v33  ;;  %6285 = vmatpush3.bf16.msra.mxu1 %v6282_v42  ;;  %v9206_v29 = vand.u32 4294901760, %v7844_v7  ;;  %5137 = vmatprep.mubr.f32.mxu0 %v7754_v14 }
  0x81   :  { %v7869_v27 = vsub.f32 %v7195_v35, %v9203_v39  ;;  %v7878_v28 = vsub.f32 %v7244_v55, %v9205_v10  ;;  %v463_v35 = vsub.f32 %v7839_v13, %v7863_v8  ;;  %v95_v39 = vld [vmem:[#allocation3 + $0xd8] sm:$0xff]  ;;  %v7887_v30 = vand.u32 4294901760, %v453_v34  ;;  %5615 = vmatmul.mubr.f32.gmra.mrb[16].mxu1 %v7728_v12 }
  0x82   :  { %v594_v40 = vand.u32 4294901760, %v593_v1  ;;  %9204 = vst [vmem:[#allocation106_spill] sm:$0xff] %v7873_v44  ;;  %v600_v50 = vsub.f32 %v7844_v7, %v9206_v29  ;;  %v9207_v25 = vand.u32 4294901760, %v7255_v60  ;;  %v473_v42 = vsub.f32 %v7856_v33, %v7873_v44  ;;  %5617 = vmatprep.mubr.f32.mxu1 %v7754_v14  ;;  %5138 = vmatmul.mubr.f32.gmra.mrb[18].mxu0 %v7785_v48 }
  0x83   :  { %v9008_v1 = vand.u32 4294901760, %v7869_v27  ;;  %v9013_v10 = vand.u32 4294901760, %v7878_v28  ;;  %v7911_v44 = vand.u32 4294901760, %v95_v39  ;;  %v9211_v8 = vand.u32 4294901760, %v7206_v41  ;;  %5140 = vmatprep.mubr.f32.mxu0 %v7800_v51 }
  0x84   :  { %v6082_v55 = vpack.c.bf16 %v594_v40, %v587_v18  ;;  %v7893_v26 = vsub.f32 %v7255_v60, %v9207_v25  ;;  %v601_v29 = vand.u32 4294901760, %v600_v50  ;;  %v7902_v18 = vand.u32 4294901760, %v94_v20  ;;  %v96_v40 = vld [vmem:[#allocation3 + $0xe0] sm:$0xff] }
  0x85   :  { %v607_v34 = vsub.f32 %v7869_v27, %v9008_v1  ;;  %v7905_v60 = vand.u32 4294901760, %v463_v35  ;;  %v2609_v12 = vsub.f32 %v7878_v28, %v9013_v10  ;;  %9209 = vst [vmem:[#allocation108_spill] sm:$0xff] %v7911_v44  ;;  %v7919_v14 = vsub.f32 %v7206_v41, %v9211_v8  ;;  %v97_v10 = vld [vmem:[#allocation3 + $0xe8] sm:$0xff]  ;;  %5618 = vmatmul.mubr.f32.gmra.mrb[18].mxu1 %v7785_v48 }
  0x86   :  { %9208 = vst [vmem:[#allocation107_spill] sm:$0xff] %v7902_v18  ;;  %6083 = vmatprep.subr.bf16.mxu0 %v6082_v55  ;;  %v7914_v1 = vsub.f32 %v94_v20, %v7902_v18  ;;  %v9212_v35 = vand.u32 4294901760, %v7224_v46  ;;  %v7931_v20 = vsub.f32 %v95_v39, %v7911_v44  ;;  %v7933_v13 = vand.u32 4294901760, %v96_v40  ;;  %5620 = vmatprep.mubr.f32.mxu1 %v7800_v51 }
  0x87   :  { %6085 = vmatpush3.bf16.msra.mxu0 %v6082_v55  ;;  %v608_v50 = vand.u32 4294901760, %v607_v34  ;;  %v2610_v25 = vand.u32 4294901760, %v2609_v12  ;;  %v9213_v55 = vand.u32 4294901760, %v7893_v26  ;;  %v9022_v8 = vand.u32 4294901760, %v7919_v14 }
  0x88   :  { %9210 = vst [vmem:[#allocation109_spill] sm:$0xff] %v7914_v1  ;;  %v7924_v33 = vsub.f32 %v7224_v46, %v9212_v35  ;;  %9214 = vst [vmem:[#allocation110_spill] sm:$0xff] %v7931_v20  ;;  %v7938_v46 = vand.u32 4294901760, %v7914_v1  ;;  %v7944_v39 = vand.u32 4294901760, %v7931_v20  ;;  %v7949_v48 = vand.u32 4294901760, %v97_v10  ;;  %5141 = vmatmul.mubr.f32.gmra.mrb[20].mxu0 %v7847_v3 }
  0x89   :  { %v2616_v34 = vsub.f32 %v7893_v26, %v9213_v55  ;;  %9215 = vst [vmem:[#allocation111_spill] sm:$0xff] %v7933_v13  ;;  %v6086_v41 = vpack.c.bf16 %v608_v50, %v601_v29  ;;  %v7947_v55 = vsub.f32 %v96_v40, %v7933_v13  ;;  %v614_v50 = vsub.f32 %v7919_v14, %v9022_v8 }
  0x8a   :  { %9216 = vst [vmem:[#allocation112_spill] sm:$0xff] %v7938_v46  ;;  %v9025_v12 = vand.u32 4294901760, %v7924_v33  ;;  %9217 = vst [vmem:[#allocation113_spill] sm:$0xff] %v7944_v39  ;;  %v483_v29 = vsub.f32 %v7914_v1, %v7938_v46  ;;  %v493_v13 = vsub.f32 %v7931_v20, %v7944_v39  ;;  %v7971_v8 = vsub.f32 %v97_v10, %v7949_v48  ;;  %v98_v1 = vld [vmem:[#allocation3 + $0xf0] sm:$0xff] }
  0x8b   :  { %v2617_v35 = vand.u32 4294901760, %v2616_v34  ;;  %9218 = vst [vmem:[#allocation114_spill] sm:$0xff] %v7947_v55  ;;  %9219 = vst [vmem:[#allocation115_spill] sm:$0xff] %v7949_v48  ;;  %6087 = vmatprep.subr.bf16.mxu0 %v6086_v41  ;;  %v9220_v34 = vand.u32 4294901760, %v7240_v53  ;;  %v7968_v46 = vand.u32 4294901760, %v7947_v55  ;;  %5621 = vmatmul.mubr.f32.gmra.mrb[20].mxu1 %v7847_v3  ;;  %v615_v18 = vand.u32 4294901760, %v614_v50 }
  0x8c   :  { %v621_v51 = vsub.f32 %v7924_v33, %v9025_v12  ;;  %9222 = vst [vmem:[#allocation117_spill] sm:$0xff] %v7971_v8  ;;  %5143 = vmatprep.mubr.f32.mxu0 %v444_v47  ;;  %v474_v12 = vand.u32 4294901760, %v473_v42  ;;  %5623 = vmatprep.mubr.f32.mxu1 %v444_v47  ;;  %v7978_v39 = vand.u32 4294901760, %v7971_v8  ;;  %v9224_v10 = vand.u32 4294901760, %v7242_v54  ;;  %v99_v3 = vld [vmem:[#allocation3 + $0xf8] sm:$0xff] }
  0x8d   :  { %v7962_v44 = vsub.f32 %v7240_v53, %v9220_v34  ;;  %v6286_v40 = vpack.c.bf16 %v2617_v35, %v2610_v25  ;;  %9221 = vst [vmem:[#allocation116_spill] sm:$0xff] %v7968_v46  ;;  %v484_v25 = vand.u32 4294901760, %v483_v29  ;;  %v503_v35 = vsub.f32 %v7947_v55, %v7968_v46  ;;  %6089 = vmatpush3.bf16.msra.mxu0 %v6086_v41 }
  0x8e   :  { %v622_v53 = vand.u32 4294901760, %v621_v51  ;;  %9223 = vst [vmem:[#allocation118_spill] sm:$0xff] %v7978_v39  ;;  %v7983_v20 = vsub.f32 %v7242_v54, %v9224_v10  ;;  %v9225_v29 = vand.u32 4294901760, %v7276_v19  ;;  %v7993_v51 = vand.u32 4294901760, %v98_v1  ;;  %5144 = vmatmul.mubr.f32.gmra.mrb[22].mxu0 %v7887_v30 }
  0x8f   :  { %v9035_v34 = vand.u32 4294901760, %v7962_v44  ;;  %6287 = vmatprep.subr.bf16.mxu1 %v6286_v40  ;;  %v494_v46 = vand.u32 4294901760, %v493_v13  ;;  %v504_v54 = vand.u32 4294901760, %v503_v35  ;;  %v9227_v41 = vand.u32 4294901760, %v7278_v11  ;;  %5624 = vmatmul.mubr.f32.gmra.mrb[22].mxu1 %v7887_v30 }
  0x90   :  { %6289 = vmatpush3.bf16.msra.mxu1 %v6286_v40  ;;  %v6090_v42 = vpack.c.bf16 %v622_v53, %v615_v18  ;;  %v7991_v50 = vsub.f32 %v7276_v19, %v9225_v29  ;;  %9226 = vst [vmem:[#allocation119_spill] sm:$0xff] %v7993_v51  ;;  %v9034_v10 = vand.u32 4294901760, %v7983_v20  ;;  %5146 = vmatprep.mubr.f32.mxu0 %v7905_v60  ;;  %v8010_v13 = vand.u32 4294901760, %v99_v3 }
  0x91   :  { %v628_v47 = vsub.f32 %v7962_v44, %v9035_v34  ;;  %v8000_v18 = vsub.f32 %v7278_v11, %v9227_v41  ;;  %v513_v19 = vsub.f32 %v7971_v8, %v7978_v39  ;;  %v8008_v53 = vsub.f32 %v98_v1, %v7993_v51  ;;  %5626 = vmatprep.mubr.f32.mxu1 %v7905_v60 }
  0x92   :  { %v9036_v40 = vand.u32 4294901760, %v7991_v50  ;;  %9228 = vst [vmem:[#allocation120_spill] sm:$0xff] %v8010_v13  ;;  %6091 = vmatprep.subr.bf16.mxu0 %v6090_v42  ;;  %v635_v11 = vsub.f32 %v7983_v20, %v9034_v10  ;;  %v9229_v29 = vand.u32 4294901760, %v7257_v61  ;;  %v9231_v10 = vand.u32 4294901760, %v7259_v62  ;;  %5147 = vmatmul.mubr.f32.gmra.mrb[24].mxu0 %v474_v12 }
  0x93   :  { %v629_v35 = vand.u32 4294901760, %v628_v47  ;;  %6093 = vmatpush3.bf16.msra.mxu0 %v6090_v42  ;;  %v8026_v60 = vand.u32 4294901760, %v8008_v53  ;;  %v8029_v47 = vsub.f32 %v99_v3, %v8010_v13  ;;  %5627 = vmatmul.mubr.f32.gmra.mrb[24].mxu1 %v474_v12  ;;  %v6298_v12 = vpack.c.bf16 %v7423_v49, %v7411_v15 }
  0x94   :  { %v8020_v41 = vsub.f32 %v7257_v61, %v9229_v29  ;;  %v2623_v1 = vsub.f32 %v7991_v50, %v9036_v40  ;;  %v8034_v34 = vsub.f32 %v7259_v62, %v9231_v10  ;;  %v636_v30 = vand.u32 4294901760, %v635_v11  ;;  %5149 = vmatprep.mubr.f32.mxu0 %v484_v25  ;;  %5629 = vmatprep.mubr.f32.mxu1 %v484_v25 }
  0x95   :  { %9230 = vst [vmem:[#allocation121_spill] sm:$0xff] %v8026_v60  ;;  %v9232_v61 = vand.u32 4294901760, %v8000_v18  ;;  %v6294_v40 = vpack.c.bf16 %v7334_v24, %v7319_v31  ;;  %v523_v39 = vsub.f32 %v8008_v53, %v8026_v60  ;;  %v8045_v62 = vand.u32 4294901760, %v8029_v47 }
  0x96   :  { %v9045_v29 = vand.u32 4294901760, %v8020_v41  ;;  %v2624_v3 = vand.u32 4294901760, %v2623_v1  ;;  %v9046_v10 = vand.u32 4294901760, %v8034_v34  ;;  %v6094_v11 = vpack.c.bf16 %v636_v30, %v629_v35  ;;  %5150 = vmatmul.mubr.f32.gmra.mrb[26].mxu0 %v494_v46 }
  0x97   :  { %v2630_v42 = vsub.f32 %v8000_v18, %v9232_v61  ;;  %v514_v55 = vand.u32 4294901760, %v513_v19  ;;  %v6302_v60 = vpack.c.bf16 %v7468_v43, %v7453_v9  ;;  %v533_v35 = vsub.f32 %v8029_v47, %v8045_v62  ;;  %5630 = vmatmul.mubr.f32.gmra.mrb[26].mxu1 %v494_v46  ;;  %5152 = vmatprep.mubr.f32.mxu0 %v504_v54  ;;  %v9233_v46 = vld [vmem:[#allocation27_spill] sm:$0xff] }
  0x98   :  { %v642_v61 = vsub.f32 %v8020_v41, %v9045_v29  ;;  %v649_v1 = vsub.f32 %v8034_v34, %v9046_v10  ;;  %6095 = vmatprep.subr.bf16.mxu0 %v6094_v11  ;;  %v524_v19 = vand.u32 4294901760, %v523_v39  ;;  %v6310_v10 = vpack.c.bf16 %v7653_v4, %v7641_v52  ;;  %5632 = vmatprep.mubr.f32.mxu1 %v504_v54  ;;  %v9234_v54 = vld [vmem:[#allocation30_spill] sm:$0xff] }
  0x99   :  { %v2631_v8 = vand.u32 4294901760, %v2630_v42  ;;  %v6306_v42 = vpack.c.bf16 %v7546_v63, %v7541_v23  ;;  %6097 = vmatpush3.bf16.msra.mxu0 %v6094_v11  ;;  %v6106_v39 = vpack.c.bf16 %v7709_v57, %v7692_v45  ;;  %v6114_v11 = vpack.c.bf16 %v7819_v32, %v7814_v6 }
  0x9a   :  { %v643_v30 = vand.u32 4294901760, %v642_v61  ;;  %v650_v29 = vand.u32 4294901760, %v649_v1  ;;  %5153 = vmatmul.mubr.f32.gmra.mrb[28].mxu0 %v514_v55  ;;  %v9238_v61 = vld [vmem:[#allocation46_spill] sm:$0xff]  ;;  %v9239_v1 = vld [vmem:[#allocation47_spill] sm:$0xff] }
  0x9b   :  { %v6290_v25 = vpack.c.bf16 %v2631_v8, %v2624_v3  ;;  %v534_v8 = vand.u32 4294901760, %v533_v35  ;;  %v6102_v3 = vpack.c.bf16 %v7627_v5, %v7607_v17  ;;  %5633 = vmatmul.mubr.f32.gmra.mrb[28].mxu1 %v514_v55  ;;  %5155 = vmatprep.mubr.f32.mxu0 %v524_v19  ;;  %v6110_v55 = vpack.c.bf16 %v7751_v22, %v7738_v58 }
  0x9c   :  { %v6098_v43 = vpack.c.bf16 %v650_v29, %v643_v30  ;;  %5635 = vmatprep.mubr.f32.mxu1 %v524_v19  ;;  %v9236_v29 = vld [vmem:[#allocation33_spill] sm:$0xff]  ;;  %v6314_v35 = vpack.c.bf16 %v7772_v38, %v7763_v16  ;;  %v6122_v30 = vpack.c.bf16 %v7924_v33, %v7919_v14  ;;  %v9242_v19 = vld [vmem:[#allocation59_spill] sm:$0xff] }
  0x9d   :  { %6291 = vmatprep.subr.bf16.mxu1 %v6290_v25 }
  0x9e   :  { %6293 = vmatpush3.bf16.msra.mxu1 %v6290_v25  ;;  %6099 = vmatprep.subr.bf16.mxu0 %v6098_v43  ;;  %v9240_v25 = vld [vmem:[#allocation48_spill] sm:$0xff] }
  0x9f   :  { %6295 = vmatprep.subr.bf16.mxu1 %v6294_v40  ;;  %6101 = vmatpush3.bf16.msra.mxu0 %v6098_v43  ;;  %v9235_v43 = vld [vmem:[#allocation32_spill] sm:$0xff] }
  0xa0   :  { %5156 = vmatmul.mubr.f32.gmra.mrb[30].mxu0 %v534_v8  ;;  %6103 = vmatprep.subr.bf16.mxu0 %v6102_v3 }
  0xa1   :  { %5636 = vmatmul.mubr.f32.gmra.mrb[30].mxu1 %v534_v8  ;;  %5190 = vmatprep.mubr.f32.mxu0 %v7305_v36  ;;  %v9243_v8 = vld [vmem:[#allocation61_spill] sm:$0xff] }
  0xa2   :  { %5670 = vmatprep.mubr.f32.mxu1 %v7305_v36 }
  0xa4   :  { %5191 = vmatmul.mubr.f32.vlgmr.msra.gmra.mrb[0].mxu0 %v9233_v46 }
  0xa5   :  { %5671 = vmatmul.mubr.f32.vlgmr.msra.gmra.mrb[0].mxu1 %v9233_v46  ;;  %5193 = vmatprep.mubr.f32.mxu0 %v9234_v54 }
  0xa6   :  { %6297 = vmatpush3.bf16.msra.mxu1 %v6294_v40  ;;  %5673 = vmatprep.mubr.f32.mxu1 %v9234_v54  ;;  %v9237_v40 = vld [vmem:[#allocation36_spill] sm:$0xff] }
  0xa7   :  { %6299 = vmatprep.subr.bf16.mxu1 %v6298_v12  ;;  %6105 = vmatpush3.bf16.msra.mxu0 %v6102_v3  ;;  %v6126_v3 = vpack.c.bf16 %v7983_v20, %v7962_v44 }
  0xa8   :  { %5194 = vmatmul.mubr.f32.gmra.mrb[2].mxu0 %v9235_v43  ;;  %6107 = vmatprep.subr.bf16.mxu0 %v6106_v39 }
  0xa9   :  { %5674 = vmatmul.mubr.f32.gmra.mrb[2].mxu1 %v9235_v43  ;;  %5196 = vmatprep.mubr.f32.mxu0 %v9236_v29 }
  0xaa   :  { %5676 = vmatprep.mubr.f32.mxu1 %v9236_v29  ;;  %6301 = vmatpush3.bf16.msra.mxu1 %v6298_v12  ;;  %v6118_v12 = vpack.c.bf16 %v7869_v27, %v7844_v7 }
  0xab   :  { %6303 = vmatprep.subr.bf16.mxu1 %v6302_v60  ;;  %6109 = vmatpush3.bf16.msra.mxu0 %v6106_v39  ;;  %v9244_v39 = vld [vmem:[#allocation63_spill] sm:$0xff] }
  0xac   :  { %5197 = vmatmul.mubr.f32.gmra.mrb[4].mxu0 %v9237_v40  ;;  %6111 = vmatprep.subr.bf16.mxu0 %v6110_v55 }
  0xad   :  { %5677 = vmatmul.mubr.f32.gmra.mrb[4].mxu1 %v9237_v40  ;;  %5199 = vmatprep.mubr.f32.mxu0 %v9238_v61 }
  0xae   :  { %5679 = vmatprep.mubr.f32.mxu1 %v9238_v61  ;;  %6305 = vmatpush3.bf16.msra.mxu1 %v6302_v60  ;;  %v9241_v60 = vld [vmem:[#allocation50_spill] sm:$0xff] }
  0xaf   :  { %6307 = vmatprep.subr.bf16.mxu1 %v6306_v42  ;;  %6113 = vmatpush3.bf16.msra.mxu0 %v6110_v55  ;;  %v9245_v55 = vld [vmem:[#allocation64_spill] sm:$0xff] }
  0xb0   :  { %5200 = vmatmul.mubr.f32.gmra.mrb[6].mxu0 %v9239_v1  ;;  %6115 = vmatprep.subr.bf16.mxu0 %v6114_v11 }
  0xb1   :  { %5680 = vmatmul.mubr.f32.gmra.mrb[6].mxu1 %v9239_v1  ;;  %5202 = vmatprep.mubr.f32.mxu0 %v9240_v25 }
  0xb2   :  { %5682 = vmatprep.mubr.f32.mxu1 %v9240_v25  ;;  %6309 = vmatpush3.bf16.msra.mxu1 %v6306_v42  ;;  %v6318_v42 = vpack.c.bf16 %v7893_v26, %v7878_v28 }
  0xb3   :  { %6311 = vmatprep.subr.bf16.mxu1 %v6310_v10  ;;  %6117 = vmatpush3.bf16.msra.mxu0 %v6114_v11  ;;  %v6130_v11 = vpack.c.bf16 %v8034_v34, %v8020_v41 }
  0xb4   :  { %5203 = vmatmul.mubr.f32.gmra.mrb[8].mxu0 %v9241_v60  ;;  %6119 = vmatprep.subr.bf16.mxu0 %v6118_v12 }
  0xb5   :  { %5683 = vmatmul.mubr.f32.gmra.mrb[8].mxu1 %v9241_v60  ;;  %5205 = vmatprep.mubr.f32.mxu0 %v9242_v19 }
  0xb6   :  { %5685 = vmatprep.mubr.f32.mxu1 %v9242_v19  ;;  %6313 = vmatpush3.bf16.msra.mxu1 %v6310_v10  ;;  %v6322_v10 = vpack.c.bf16 %v8000_v18, %v7991_v50  ;;  %v9288_v19 = vld [vmem:[#allocation28_spill] sm:$0xff] }
  0xb7   :  { %6315 = vmatprep.subr.bf16.mxu1 %v6314_v35  ;;  %6121 = vmatpush3.bf16.msra.mxu0 %v6118_v12  ;;  %v9246_v12 = vld [vmem:[#allocation68_spill] sm:$0xff] }
  0xb8   :  { %5206 = vmatmul.mubr.f32.gmra.mrb[10].mxu0 %v9243_v8  ;;  %6123 = vmatprep.subr.bf16.mxu0 %v6122_v30 }
  0xb9   :  { %5686 = vmatmul.mubr.f32.gmra.mrb[10].mxu1 %v9243_v8  ;;  %5208 = vmatprep.mubr.f32.mxu0 %v9244_v39 }
  0xba   :  { %5688 = vmatprep.mubr.f32.mxu1 %v9244_v39  ;;  %6317 = vmatpush3.bf16.msra.mxu1 %v6314_v35  ;;  %v9247_v35 = vld [vmem:[#allocation74_spill] sm:$0xff]  ;;  %v9250_v39 = vld [vmem:[#allocation13_spill] sm:$0xff] }
  0xbb   :  { %6319 = vmatprep.subr.bf16.mxu1 %v6318_v42  ;;  %6125 = vmatpush3.bf16.msra.mxu0 %v6122_v30  ;;  %v9248_v30 = vld [vmem:[#allocation14_spill] sm:$0xff] }
  0xbc   :  { %5209 = vmatmul.mubr.f32.gmra.mrb[12].mxu0 %v9245_v55  ;;  %6127 = vmatprep.subr.bf16.mxu0 %v6126_v3 }
  0xbd   :  { %5689 = vmatmul.mubr.f32.gmra.mrb[12].mxu1 %v9245_v55  ;;  %5211 = vmatprep.mubr.f32.mxu0 %v9246_v12  ;;  %v9249_v55 = vld [vmem:[#allocation79_spill] sm:$0xff] }
  0xbe   :  { %5691 = vmatprep.mubr.f32.mxu1 %v9246_v12  ;;  %6321 = vmatpush3.bf16.msra.mxu1 %v6318_v42  ;;  %v9251_v42 = vld [vmem:[#allocation82_spill] sm:$0xff]  ;;  %v9283_v12 = vld [vmem:[#allocation73_spill] sm:$0xff] }
  0xbf   :  { %6323 = vmatprep.subr.bf16.mxu1 %v6322_v10  ;;  %6129 = vmatpush3.bf16.msra.mxu0 %v6126_v3  ;;  %v9252_v3 = vld [vmem:[#allocation90_spill] sm:$0xff] }
  0xc0   :  { %5212 = vmatmul.mubr.f32.gmra.mrb[14].mxu0 %v7565_v2  ;;  %6131 = vmatprep.subr.bf16.mxu0 %v6130_v11 }
  0xc1   :  { %5692 = vmatmul.mubr.f32.gmra.mrb[14].mxu1 %v7565_v2  ;;  %5214 = vmatprep.mubr.f32.mxu0 %v9247_v35  ;;  %v9282_v2 = vld [vmem:[#allocation25_spill] sm:$0xff] }
  0xc2   :  { %5694 = vmatprep.mubr.f32.mxu1 %v9247_v35  ;;  %6325 = vmatpush3.bf16.msra.mxu1 %v6322_v10  ;;  %v9253_v10 = vld [vmem:[#allocation95_spill] sm:$0xff]  ;;  %v9279_v35 = vld [vmem:[#allocation66_spill] sm:$0xff] }
  0xc3   :  { %6133 = vmatpush3.bf16.msra.mxu0 %v6130_v11  ;;  %6327 = vmatprep.subr.bf16.mxu1 %v9248_v30  ;;  %v9254_v11 = vld [vmem:[#allocation107_spill] sm:$0xff] }
  0xc4   :  { %5215 = vmatmul.mubr.f32.gmra.mrb[16].mxu0 %v9249_v55  ;;  %6135 = vmatprep.subr.bf16.mxu0 %v9250_v39 }
  0xc5   :  { %5695 = vmatmul.mubr.f32.gmra.mrb[16].mxu1 %v9249_v55  ;;  %5217 = vmatprep.mubr.f32.mxu0 %v9251_v42  ;;  %v9278_v55 = vld [vmem:[#allocation23_spill] sm:$0xff] }
  0xc6   :  { %5697 = vmatprep.mubr.f32.mxu1 %v9251_v42  ;;  %v9275_v42 = vld [vmem:[#allocation60_spill] sm:$0xff] }
  0xc8   :  { %5218 = vmatmul.mubr.f32.gmra.mrb[18].mxu0 %v7682_v21 }
  0xc9   :  { %5698 = vmatmul.mubr.f32.gmra.mrb[18].mxu1 %v7682_v21  ;;  %5220 = vmatprep.mubr.f32.mxu0 %v7719_v59  ;;  %v9274_v21 = vld [vmem:[#allocation21_spill] sm:$0xff] }
  0xca   :  { %5700 = vmatprep.mubr.f32.mxu1 %v7719_v59  ;;  %v9271_v59 = vld [vmem:[#allocation52_spill] sm:$0xff] }
  0xcc   :  { %5221 = vmatmul.mubr.f32.gmra.mrb[20].mxu0 %v9252_v3 }
  0xcd   :  { %5701 = vmatmul.mubr.f32.gmra.mrb[20].mxu1 %v9252_v3  ;;  %5223 = vmatprep.mubr.f32.mxu0 %v9253_v10  ;;  %v9255_v3 = vld [vmem:[#allocation108_spill] sm:$0xff] }
  0xce   :  { %5703 = vmatprep.mubr.f32.mxu1 %v9253_v10  ;;  %v9256_v10 = vld [vmem:[#allocation111_spill] sm:$0xff] }
  0xd0   :  { %5224 = vmatmul.mubr.f32.gmra.mrb[22].mxu0 %v7805_v0 }
  0xd1   :  { %5704 = vmatmul.mubr.f32.gmra.mrb[22].mxu1 %v7805_v0  ;;  %5226 = vmatprep.mubr.f32.mxu0 %v7826_v56  ;;  %v9270_v0 = vld [vmem:[#allocation19_spill] sm:$0xff] }
  0xd2   :  { %5706 = vmatprep.mubr.f32.mxu1 %v7826_v56  ;;  %v9267_v56 = vld [vmem:[#allocation49_spill] sm:$0xff] }
  0xd4   :  { %5227 = vmatmul.mubr.f32.gmra.mrb[24].mxu0 %v7833_v37 }
  0xd5   :  { %5707 = vmatmul.mubr.f32.gmra.mrb[24].mxu1 %v7833_v37  ;;  %5229 = vmatprep.mubr.f32.mxu0 %v9254_v11  ;;  %v9266_v37 = vld [vmem:[#allocation17_spill] sm:$0xff] }
  0xd6   :  { %5709 = vmatprep.mubr.f32.mxu1 %v9254_v11  ;;  %v9257_v11 = vld [vmem:[#allocation29_spill] sm:$0xff] }
  0xd8   :  { %5230 = vmatmul.mubr.f32.gmra.mrb[26].mxu0 %v9255_v3 }
  0xd9   :  { %5710 = vmatmul.mubr.f32.gmra.mrb[26].mxu1 %v9255_v3  ;;  %5232 = vmatprep.mubr.f32.mxu0 %v9256_v10  ;;  %v9258_v3 = vld [vmem:[#allocation31_spill] sm:$0xff] }
  0xda   :  { %5712 = vmatprep.mubr.f32.mxu1 %v9256_v10  ;;  %v9259_v10 = vld [vmem:[#allocation35_spill] sm:$0xff] }
  0xdc   :  { %5233 = vmatmul.mubr.f32.gmra.mrb[28].mxu0 %v7949_v48 }
  0xdd   :  { %5713 = vmatmul.mubr.f32.gmra.mrb[28].mxu1 %v7949_v48  ;;  %5235 = vmatprep.mubr.f32.mxu0 %v7993_v51  ;;  %v9260_v48 = vld [vmem:[#allocation16_spill] sm:$0xff] }
  0xde   :  { %5715 = vmatprep.mubr.f32.mxu1 %v7993_v51  ;;  %v9261_v51 = vld [vmem:[#allocation38_spill] sm:$0xff] }
  0xe0   :  { %5236 = vmatmul.mubr.f32.gmra.mrb[30].mxu0 %v8010_v13 }
  0xe1   :  { %5716 = vmatmul.mubr.f32.gmra.mrb[30].mxu1 %v8010_v13  ;;  %5270 = vmatprep.mubr.f32.mxu0 %v9257_v11  ;;  %v9262_v13 = vld [vmem:[#allocation15_spill] sm:$0xff] }
  0xe2   :  { %5750 = vmatprep.mubr.f32.mxu1 %v9257_v11  ;;  %v9263_v11 = vld [vmem:[#allocation39_spill] sm:$0xff] }
  0xe4   :  { %5271 = vmatmul.mubr.f32.vlgmr.msra.gmra.mrb[0].mxu0 %v9258_v3 }
  0xe5   :  { %5751 = vmatmul.mubr.f32.vlgmr.msra.gmra.mrb[0].mxu1 %v9258_v3  ;;  %5273 = vmatprep.mubr.f32.mxu0 %v9259_v10  ;;  %v9264_v3 = vld [vmem:[#allocation18_spill] sm:$0xff] }
  0xe6   :  { %6329 = vmatpush3.bf16.msra.mxu1 %v9248_v30  ;;  %5753 = vmatprep.mubr.f32.mxu1 %v9259_v10  ;;  %v9265_v10 = vld [vmem:[#allocation41_spill] sm:$0xff] }
  0xe7   :  { %6331 = vmatprep.subr.bf16.mxu1 %v9260_v48  ;;  %6137 = vmatpush3.bf16.msra.mxu0 %v9250_v39 }
  0xe8   :  { %5274 = vmatmul.mubr.f32.gmra.mrb[2].mxu0 %v9261_v51  ;;  %6139 = vmatprep.subr.bf16.mxu0 %v9262_v13 }
  0xe9   :  { %5754 = vmatmul.mubr.f32.gmra.mrb[2].mxu1 %v9261_v51  ;;  %5276 = vmatprep.mubr.f32.mxu0 %v9263_v11  ;;  %v9268_v51 = vld [vmem:[#allocation20_spill] sm:$0xff] }
  0xea   :  { %5756 = vmatprep.mubr.f32.mxu1 %v9263_v11  ;;  %6333 = vmatpush3.bf16.msra.mxu1 %v9260_v48  ;;  %v9269_v11 = vld [vmem:[#allocation51_spill] sm:$0xff] }
  0xeb   :  { %6335 = vmatprep.subr.bf16.mxu1 %v9264_v3  ;;  %6141 = vmatpush3.bf16.msra.mxu0 %v9262_v13 }
  0xec   :  { %5277 = vmatmul.mubr.f32.gmra.mrb[4].mxu0 %v9265_v10  ;;  %6143 = vmatprep.subr.bf16.mxu0 %v9266_v37 }
  0xed   :  { %5757 = vmatmul.mubr.f32.gmra.mrb[4].mxu1 %v9265_v10  ;;  %5279 = vmatprep.mubr.f32.mxu0 %v9267_v56  ;;  %v9272_v10 = vld [vmem:[#allocation22_spill] sm:$0xff] }
  0xee   :  { %5759 = vmatprep.mubr.f32.mxu1 %v9267_v56  ;;  %6337 = vmatpush3.bf16.msra.mxu1 %v9264_v3  ;;  %v9273_v56 = vld [vmem:[#allocation55_spill] sm:$0xff] }
  0xef   :  { %6339 = vmatprep.subr.bf16.mxu1 %v9268_v51  ;;  %6145 = vmatpush3.bf16.msra.mxu0 %v9266_v37 }
  0xf0   :  { %5280 = vmatmul.mubr.f32.gmra.mrb[6].mxu0 %v9269_v11  ;;  %6147 = vmatprep.subr.bf16.mxu0 %v9270_v0 }
  0xf1   :  { %5760 = vmatmul.mubr.f32.gmra.mrb[6].mxu1 %v9269_v11  ;;  %5282 = vmatprep.mubr.f32.mxu0 %v9271_v59  ;;  %v9276_v11 = vld [vmem:[#allocation24_spill] sm:$0xff] }
  0xf2   :  { %5762 = vmatprep.mubr.f32.mxu1 %v9271_v59  ;;  %6341 = vmatpush3.bf16.msra.mxu1 %v9268_v51  ;;  %v9277_v59 = vld [vmem:[#allocation65_spill] sm:$0xff] }
  0xf3   :  { %6343 = vmatprep.subr.bf16.mxu1 %v9272_v10  ;;  %6149 = vmatpush3.bf16.msra.mxu0 %v9270_v0 }
  0xf4   :  { %5283 = vmatmul.mubr.f32.gmra.mrb[8].mxu0 %v9273_v56  ;;  %6151 = vmatprep.subr.bf16.mxu0 %v9274_v21 }
  0xf5   :  { %5763 = vmatmul.mubr.f32.gmra.mrb[8].mxu1 %v9273_v56  ;;  %5285 = vmatprep.mubr.f32.mxu0 %v9275_v42  ;;  %v9280_v56 = vld [vmem:[#allocation26_spill] sm:$0xff] }
  0xf6   :  { %5765 = vmatprep.mubr.f32.mxu1 %v9275_v42  ;;  %6345 = vmatpush3.bf16.msra.mxu1 %v9272_v10  ;;  %v9281_v42 = vld [vmem:[#allocation67_spill] sm:$0xff] }
  0xf7   :  { %6347 = vmatprep.subr.bf16.mxu1 %v9276_v11  ;;  %6153 = vmatpush3.bf16.msra.mxu0 %v9274_v21  ;;  %v9290_v21 = vand.u32 4294901760, %v7627_v5  ;;  %v9296_v5 = vld [vmem:[#allocation92_spill] sm:$0xff] }
  0xf8   :  { %5286 = vmatmul.mubr.f32.gmra.mrb[10].mxu0 %v9277_v59  ;;  %6155 = vmatprep.subr.bf16.mxu0 %v9278_v55 }
  0xf9   :  { %5766 = vmatmul.mubr.f32.gmra.mrb[10].mxu1 %v9277_v59  ;;  %5288 = vmatprep.mubr.f32.mxu0 %v9279_v35  ;;  %v9284_v59 = vld [vmem:[#allocation45_spill] sm:$0xff] }
  0xfa   :  { %5768 = vmatprep.mubr.f32.mxu1 %v9279_v35  ;;  %6349 = vmatpush3.bf16.msra.mxu1 %v9276_v11  ;;  %v9285_v35 = vand.u32 4294901760, %v7319_v31  ;;  %v9287_v11 = vld [vmem:[#allocation76_spill] sm:$0xff]  ;;  %v9294_v31 = vld [vmem:[#allocation87_spill] sm:$0xff] }
  0xfb   :  { %6351 = vmatprep.subr.bf16.mxu1 %v9280_v56  ;;  %6157 = vmatpush3.bf16.msra.mxu0 %v9278_v55  ;;  %v9286_v55 = vand.u32 4294901760, %v7334_v24  ;;  %v9292_v24 = vld [vmem:[#allocation81_spill] sm:$0xff] }
  0xfc   :  { %5289 = vmatmul.mubr.f32.gmra.mrb[12].mxu0 %v9281_v42  ;;  %6159 = vmatprep.subr.bf16.mxu0 %v9282_v2 }
  0xfd   :  { %5769 = vmatmul.mubr.f32.gmra.mrb[12].mxu1 %v9281_v42  ;;  %5291 = vmatprep.mubr.f32.mxu0 %v9283_v12  ;;  %v6358_v8 = vpack.c.bf16 %v9286_v55, %v9285_v35  ;;  %v9289_v42 = vand.u32 4294901760, %v7607_v17  ;;  %v9293_v17 = vld [vmem:[#allocation84_spill] sm:$0xff] }
  0xfe   :  { %5771 = vmatprep.mubr.f32.mxu1 %v9283_v12  ;;  %6353 = vmatpush3.bf16.msra.mxu1 %v9280_v56  ;;  %v9291_v56 = vld [vmem:[#allocation78_spill] sm:$0xff]  ;;  %v9297_v55 = vld [vmem:[#allocation96_spill] sm:$0xff] }
  0xff   :  { %6355 = vmatprep.subr.bf16.mxu1 %v9284_v59  ;;  %6161 = vmatpush3.bf16.msra.mxu0 %v9282_v2  ;;  %v6166_v12 = vpack.c.bf16 %v9290_v21, %v9289_v42  ;;  %v9295_v21 = vld [vmem:[#allocation91_spill] sm:$0xff]  ;;  %v9300_v35 = vld [vmem:[#allocation104_spill] sm:$0xff]  ;;  %v9301_v42 = vld [vmem:[#allocation109_spill] sm:$0xff] }
 0x100   :  { %5292 = vmatmul.mubr.f32.gmra.mrb[14].mxu0 %v9287_v11  ;;  %6163 = vmatprep.subr.bf16.mxu0 %v9288_v19 }
 0x101   :  { %5772 = vmatmul.mubr.f32.gmra.mrb[14].mxu1 %v9287_v11  ;;  %5294 = vmatprep.mubr.f32.mxu0 %v9291_v56  ;;  %v9298_v11 = vld [vmem:[#allocation99_spill] sm:$0xff] }
 0x102   :  { %5774 = vmatprep.mubr.f32.mxu1 %v9291_v56  ;;  %6357 = vmatpush3.bf16.msra.mxu1 %v9284_v59  ;;  %v9299_v56 = vld [vmem:[#allocation103_spill] sm:$0xff] }
 0x103   :  { %6165 = vmatpush3.bf16.msra.mxu0 %v9288_v19  ;;  %6359 = vmatprep.subr.bf16.mxu1 %v6358_v8 }
 0x104   :  { %5295 = vmatmul.mubr.f32.gmra.mrb[16].mxu0 %v9292_v24  ;;  %6167 = vmatprep.subr.bf16.mxu0 %v6166_v12 }
 0x105   :  { %5775 = vmatmul.mubr.f32.gmra.mrb[16].mxu1 %v9292_v24  ;;  %5297 = vmatprep.mubr.f32.mxu0 %v9293_v17  ;;  %v9302_v24 = vld [vmem:[#allocation110_spill] sm:$0xff] }
 0x106   :  { %5777 = vmatprep.mubr.f32.mxu1 %v9293_v17  ;;  %v9303_v17 = vld [vmem:[#allocation114_spill] sm:$0xff] }
 0x108   :  { %5298 = vmatmul.mubr.f32.gmra.mrb[18].mxu0 %v9294_v31 }
 0x109   :  { %5778 = vmatmul.mubr.f32.gmra.mrb[18].mxu1 %v9294_v31  ;;  %5300 = vmatprep.mubr.f32.mxu0 %v9295_v21  ;;  %v9304_v31 = vld [vmem:[#allocation117_spill] sm:$0xff] }
 0x10a   :  { %5780 = vmatprep.mubr.f32.mxu1 %v9295_v21  ;;  %v9305_v21 = vld [vmem:[#allocation34_spill] sm:$0xff] }
 0x10c   :  { %5301 = vmatmul.mubr.f32.gmra.mrb[20].mxu0 %v9296_v5 }
 0x10d   :  { %5781 = vmatmul.mubr.f32.gmra.mrb[20].mxu1 %v9296_v5  ;;  %5303 = vmatprep.mubr.f32.mxu0 %v9297_v55  ;;  %v9306_v5 = vand.u32 4294901760, %v7411_v15  ;;  %v9312_v15 = vand.u32 4294901760, %v7453_v9  ;;  %v9319_v9 = vand.u32 4294901760, %v7541_v23  ;;  %v9326_v23 = vand.u32 4294901760, %v7653_v4 }
 0x10e   :  { %5783 = vmatprep.mubr.f32.mxu1 %v9297_v55  ;;  %v9307_v55 = vand.u32 4294901760, %v7423_v49  ;;  %v9332_v4 = vand.u32 4294901760, %v7772_v38  ;;  %v9338_v38 = vand.u32 4294901760, %v7893_v26  ;;  %v9344_v26 = vand.u32 4294901760, %v8000_v18  ;;  %v9350_v18 = vld [vmem:[#allocation80_spill] sm:$0xff] }
 0x110   :  { %5304 = vmatmul.mubr.f32.gmra.mrb[22].mxu0 %v9298_v11 }
 0x111   :  { %5784 = vmatmul.mubr.f32.gmra.mrb[22].mxu1 %v9298_v11  ;;  %5306 = vmatprep.mubr.f32.mxu0 %v9299_v56  ;;  %v6362_v11 = vpack.c.bf16 %v9307_v55, %v9306_v5  ;;  %v9321_v55 = vld [vmem:[#allocation44_spill] sm:$0xff] }
 0x112   :  { %5786 = vmatprep.mubr.f32.mxu1 %v9299_v56  ;;  %v9308_v56 = vld [vmem:[#allocation37_spill] sm:$0xff] }
 0x114   :  { %5307 = vmatmul.mubr.f32.gmra.mrb[24].mxu0 %v9300_v35 }
 0x115   :  { %5787 = vmatmul.mubr.f32.gmra.mrb[24].mxu1 %v9300_v35  ;;  %5309 = vmatprep.mubr.f32.mxu0 %v9301_v42  ;;  %v9309_v35 = vand.u32 4294901760, %v7692_v45  ;;  %v9316_v45 = vand.u32 4294901760, %v7738_v58  ;;  %v9323_v58 = vand.u32 4294901760, %v7819_v32  ;;  %v9329_v32 = vand.u32 4294901760, %v7869_v27 }
 0x116   :  { %5789 = vmatprep.mubr.f32.mxu1 %v9301_v42  ;;  %v9310_v42 = vand.u32 4294901760, %v7709_v57  ;;  %v9317_v57 = vand.u32 4294901760, %v7751_v22  ;;  %v9322_v22 = vand.u32 4294901760, %v7814_v6  ;;  %v9328_v6 = vand.u32 4294901760, %v7844_v7 }
 0x117   :  { %v9334_v27 = vand.u32 4294901760, %v7919_v14  ;;  %v9335_v7 = vand.u32 4294901760, %v7924_v33  ;;  %v9340_v33 = vand.u32 4294901760, %v7962_v44  ;;  %v9341_v14 = vand.u32 4294901760, %v7983_v20 }
 0x118   :  { %5310 = vmatmul.mubr.f32.gmra.mrb[26].mxu0 %v9302_v24  ;;  %v9346_v44 = vand.u32 4294901760, %v8020_v41  ;;  %v9347_v20 = vand.u32 4294901760, %v8034_v34  ;;  %v9351_v34 = vld [vmem:[#allocation83_spill] sm:$0xff]  ;;  %v9352_v41 = vld [vmem:[#allocation86_spill] sm:$0xff] }
 0x119   :  { %5790 = vmatmul.mubr.f32.gmra.mrb[26].mxu1 %v9302_v24  ;;  %5312 = vmatprep.mubr.f32.mxu0 %v9303_v17  ;;  %v9311_v24 = vld [vmem:[#allocation40_spill] sm:$0xff] }
 0x11a   :  { %5792 = vmatprep.mubr.f32.mxu1 %v9303_v17 }
 0x11c   :  { %5313 = vmatmul.mubr.f32.gmra.mrb[28].mxu0 %v9304_v31 }
 0x11d   :  { %5793 = vmatmul.mubr.f32.gmra.mrb[28].mxu1 %v9304_v31  ;;  %5315 = vmatprep.mubr.f32.mxu0 %v8008_v53  ;;  %v9315_v31 = vld [vmem:[#allocation42_spill] sm:$0xff] }
 0x11e   :  { %5795 = vmatprep.mubr.f32.mxu1 %v8008_v53  ;;  %v6170_v53 = vpack.c.bf16 %v9310_v42, %v9309_v35  ;;  %v9324_v35 = vld [vmem:[#allocation54_spill] sm:$0xff]  ;;  %v9327_v42 = vld [vmem:[#allocation56_spill] sm:$0xff] }
 0x120   :  { %5316 = vmatmul.mubr.f32.gmra.mrb[30].mxu0 %v8029_v47 }
 0x121   :  { %5796 = vmatmul.mubr.f32.gmra.mrb[30].mxu1 %v8029_v47  ;;  %5350 = vmatprep.mubr.f32.mxu0 %v9305_v21  ;;  %v9313_v47 = vld [vmem:[#allocation53_spill] sm:$0xff] }
 0x122   :  { %5830 = vmatprep.mubr.f32.mxu1 %v9305_v21  ;;  %v9314_v49 = vand.u32 4294901760, %v9313_v47  ;;  %v6174_v21 = vpack.c.bf16 %v9317_v57, %v9316_v45  ;;  %v9333_v47 = vld [vmem:[#allocation58_spill] sm:$0xff]  ;;  %v9339_v45 = vld [vmem:[#allocation69_spill] sm:$0xff]  ;;  %v6190_v57 = vpack.c.bf16 %v9341_v14, %v9340_v33 }
 0x124   :  { %5351 = vmatmul.mubr.f32.vlgmr.msra.gmra.mrb[0].mxu0 %v9308_v56  ;;  %v6366_v17 = vpack.c.bf16 %v9314_v49, %v9312_v15  ;;  %v6186_v49 = vpack.c.bf16 %v9335_v7, %v9334_v27  ;;  %v9383_v27 = vld [vmem:[#allocation100_spill] sm:$0xff]  ;;  %v9384_v7 = vld [vmem:[#allocation101_spill] sm:$0xff] }
 0x125   :  { %5831 = vmatmul.mubr.f32.vlgmr.msra.gmra.mrb[0].mxu1 %v9308_v56  ;;  %5353 = vmatprep.mubr.f32.mxu0 %v9311_v24  ;;  %v6178_v56 = vpack.c.bf16 %v9323_v58, %v9322_v22  ;;  %v9354_v22 = vld [vmem:[#allocation93_spill] sm:$0xff]  ;;  %v9355_v58 = vld [vmem:[#allocation94_spill] sm:$0xff] }
 0x126   :  { %6361 = vmatpush3.bf16.msra.mxu1 %v6358_v8  ;;  %5833 = vmatprep.mubr.f32.mxu1 %v9311_v24  ;;  %v9318_v8 = vld [vmem:[#allocation43_spill] sm:$0xff]  ;;  %v9330_v24 = vld [vmem:[#allocation57_spill] sm:$0xff] }
 0x127   :  { %6363 = vmatprep.subr.bf16.mxu1 %v6362_v11  ;;  %6169 = vmatpush3.bf16.msra.mxu0 %v6166_v12  ;;  %v9320_v12 = vand.u32 4294901760, %v7546_v63  ;;  %v9325_v63 = vand.u32 4294901760, %v7641_v52  ;;  %v9331_v52 = vand.u32 4294901760, %v7763_v16  ;;  %v9337_v16 = vand.u32 4294901760, %v7878_v28 }
 0x128   :  { %5354 = vmatmul.mubr.f32.gmra.mrb[2].mxu0 %v9315_v31  ;;  %6171 = vmatprep.subr.bf16.mxu0 %v6170_v53  ;;  %v9343_v28 = vand.u32 4294901760, %v7991_v50  ;;  %v9349_v50 = vld [vmem:[#allocation77_spill] sm:$0xff] }
 0x129   :  { %5834 = vmatmul.mubr.f32.gmra.mrb[2].mxu1 %v9315_v31  ;;  %5356 = vmatprep.mubr.f32.mxu0 %v9318_v8  ;;  %v6370_v5 = vpack.c.bf16 %v9320_v12, %v9319_v9  ;;  %v6378_v15 = vpack.c.bf16 %v9332_v4, %v9331_v52  ;;  %v6382_v31 = vpack.c.bf16 %v9338_v38, %v9337_v16  ;;  %v9345_v9 = vld [vmem:[#allocation72_spill] sm:$0xff]  ;;  %v9376_v52 = vld [vmem:[#allocation79_spill] sm:$0xff]  ;;  %v9377_v4 = vld [vmem:[#allocation82_spill] sm:$0xff] }
 0x12a   :  { %5836 = vmatprep.mubr.f32.mxu1 %v9318_v8  ;;  %6365 = vmatpush3.bf16.msra.mxu1 %v6362_v11  ;;  %v6374_v11 = vpack.c.bf16 %v9326_v23, %v9325_v63  ;;  %v6386_v8 = vpack.c.bf16 %v9344_v26, %v9343_v28  ;;  %v6194_v12 = vpack.c.bf16 %v9347_v20, %v9346_v44  ;;  %v9358_v63 = vld [vmem:[#allocation105_spill] sm:$0xff]  ;;  %v9359_v23 = vld [vmem:[#allocation106_spill] sm:$0xff]  ;;  %v9387_v16 = vld [vmem:[#allocation111_spill] sm:$0xff] }
 0x12b   :  { %6367 = vmatprep.subr.bf16.mxu1 %v6366_v17  ;;  %6173 = vmatpush3.bf16.msra.mxu0 %v6170_v53  ;;  %v6182_v53 = vpack.c.bf16 %v9329_v32, %v9328_v6  ;;  %v9362_v6 = vld [vmem:[#allocation116_spill] sm:$0xff]  ;;  %v9363_v32 = vld [vmem:[#allocation118_spill] sm:$0xff]  ;;  %v9388_v38 = vld [vmem:[#allocation115_spill] sm:$0xff] }
 0x12c   :  { %5357 = vmatmul.mubr.f32.gmra.mrb[4].mxu0 %v9321_v55  ;;  %6175 = vmatprep.subr.bf16.mxu0 %v6174_v21 }
 0x12d   :  { %5837 = vmatmul.mubr.f32.gmra.mrb[4].mxu1 %v9321_v55  ;;  %5359 = vmatprep.mubr.f32.mxu0 %v9324_v35  ;;  %v9353_v55 = vld [vmem:[#allocation88_spill] sm:$0xff] }
 0x12e   :  { %5839 = vmatprep.mubr.f32.mxu1 %v9324_v35  ;;  %6369 = vmatpush3.bf16.msra.mxu1 %v6366_v17  ;;  %v9336_v17 = vld [vmem:[#allocation62_spill] sm:$0xff] }
 0x12f   :  { %6371 = vmatprep.subr.bf16.mxu1 %v6370_v5  ;;  %6177 = vmatpush3.bf16.msra.mxu0 %v6174_v21  ;;  %v9342_v21 = vld [vmem:[#allocation71_spill] sm:$0xff]  ;;  %v9357_v35 = vld [vmem:[#allocation102_spill] sm:$0xff] }
 0x130   :  { %5360 = vmatmul.mubr.f32.gmra.mrb[6].mxu0 %v9327_v42  ;;  %6179 = vmatprep.subr.bf16.mxu0 %v6178_v56 }
 0x131   :  { %5840 = vmatmul.mubr.f32.gmra.mrb[6].mxu1 %v9327_v42  ;;  %5362 = vmatprep.mubr.f32.mxu0 %v9330_v24  ;;  %v9361_v42 = vld [vmem:[#allocation113_spill] sm:$0xff] }
 0x132   :  { %5842 = vmatprep.mubr.f32.mxu1 %v9330_v24  ;;  %6373 = vmatpush3.bf16.msra.mxu1 %v6370_v5  ;;  %v9348_v5 = vld [vmem:[#allocation75_spill] sm:$0xff]  ;;  %v9375_v24 = vld [vmem:[#allocation74_spill] sm:$0xff] }
 0x133   :  { %6375 = vmatprep.subr.bf16.mxu1 %v6374_v11  ;;  %6181 = vmatpush3.bf16.msra.mxu0 %v6178_v56  ;;  %v9356_v56 = vld [vmem:[#allocation98_spill] sm:$0xff] }
 0x134   :  { %5363 = vmatmul.mubr.f32.gmra.mrb[8].mxu0 %v9333_v47  ;;  %6183 = vmatprep.subr.bf16.mxu0 %v6182_v53 }
 0x135   :  { %5843 = vmatmul.mubr.f32.gmra.mrb[8].mxu1 %v9333_v47  ;;  %5365 = vmatprep.mubr.f32.mxu0 %v9336_v17  ;;  %v9380_v47 = vld [vmem:[#allocation90_spill] sm:$0xff] }
 0x136   :  { %5845 = vmatprep.mubr.f32.mxu1 %v9336_v17  ;;  %6377 = vmatpush3.bf16.msra.mxu1 %v6374_v11  ;;  %v9360_v11 = vld [vmem:[#allocation112_spill] sm:$0xff] }
 0x137   :  { %6379 = vmatprep.subr.bf16.mxu1 %v6378_v15  ;;  %6185 = vmatpush3.bf16.msra.mxu0 %v6182_v53  ;;  %v9364_v53 = vld [vmem:[#allocation121_spill] sm:$0xff]  ;;  %v9386_v17 = vld [vmem:[#allocation108_spill] sm:$0xff] }
 0x138   :  { %5366 = vmatmul.mubr.f32.gmra.mrb[10].mxu0 %v9339_v45  ;;  %6187 = vmatprep.subr.bf16.mxu0 %v6186_v49 }
 0x139   :  { %5846 = vmatmul.mubr.f32.gmra.mrb[10].mxu1 %v9339_v45  ;;  %5368 = vmatprep.mubr.f32.mxu0 %v9342_v21  ;;  %v9390_v45 = vld [vmem:[#allocation120_spill] sm:$0xff] }
 0x13a   :  { %5848 = vmatprep.mubr.f32.mxu1 %v9342_v21  ;;  %6381 = vmatpush3.bf16.msra.mxu1 %v6378_v15  ;;  %v9379_v15 = vld [vmem:[#allocation89_spill] sm:$0xff] }
 0x13b   :  { %6383 = vmatprep.subr.bf16.mxu1 %v6382_v31  ;;  %6189 = vmatpush3.bf16.msra.mxu0 %v6186_v49  ;;  %v9385_v49 = vld [vmem:[#allocation107_spill] sm:$0xff] }
 0x13c   :  { %5369 = vmatmul.mubr.f32.gmra.mrb[12].mxu0 %v9345_v9  ;;  %6191 = vmatprep.subr.bf16.mxu0 %v6190_v57 }
 0x13d   :  { %5849 = vmatmul.mubr.f32.gmra.mrb[12].mxu1 %v9345_v9  ;;  %5371 = vmatprep.mubr.f32.mxu0 %v9348_v5 }
 0x13e   :  { %5851 = vmatprep.mubr.f32.mxu1 %v9348_v5  ;;  %6385 = vmatpush3.bf16.msra.mxu1 %v6382_v31  ;;  %v9389_v31 = vld [vmem:[#allocation119_spill] sm:$0xff] }
 0x13f   :  { %6387 = vmatprep.subr.bf16.mxu1 %v6386_v8  ;;  %6193 = vmatpush3.bf16.msra.mxu0 %v6190_v57 }
 0x140   :  { %5372 = vmatmul.mubr.f32.gmra.mrb[14].mxu0 %v9349_v50  ;;  %6195 = vmatprep.subr.bf16.mxu0 %v6194_v12 }
 0x141   :  { %5852 = vmatmul.mubr.f32.gmra.mrb[14].mxu1 %v9349_v50  ;;  %5374 = vmatprep.mubr.f32.mxu0 %v9350_v18 }
 0x142   :  { %5854 = vmatprep.mubr.f32.mxu1 %v9350_v18  ;;  %6389 = vmatpush3.bf16.msra.mxu1 %v6386_v8 }
 0x143   :  { %6197 = vmatpush3.bf16.msra.mxu0 %v6194_v12  ;;  %6391 = vmatprep.subr.bf16.mxu1 %v9248_v30 }
 0x144   :  { %5375 = vmatmul.mubr.f32.gmra.mrb[16].mxu0 %v9351_v34  ;;  %6199 = vmatprep.subr.bf16.mxu0 %v9250_v39 }
 0x145   :  { %5855 = vmatmul.mubr.f32.gmra.mrb[16].mxu1 %v9351_v34  ;;  %5377 = vmatprep.mubr.f32.mxu0 %v9352_v41 }
 0x146   :  { %5857 = vmatprep.mubr.f32.mxu1 %v9352_v41 }
 0x148   :  { %5378 = vmatmul.mubr.f32.gmra.mrb[18].mxu0 %v9353_v55 }
 0x149   :  { %5858 = vmatmul.mubr.f32.gmra.mrb[18].mxu1 %v9353_v55  ;;  %5380 = vmatprep.mubr.f32.mxu0 %v9354_v22 }
 0x14a   :  { %5860 = vmatprep.mubr.f32.mxu1 %v9354_v22 }
 0x14c   :  { %5381 = vmatmul.mubr.f32.gmra.mrb[20].mxu0 %v9355_v58 }
 0x14d   :  { %5861 = vmatmul.mubr.f32.gmra.mrb[20].mxu1 %v9355_v58  ;;  %5383 = vmatprep.mubr.f32.mxu0 %v9356_v56 }
 0x14e   :  { %5863 = vmatprep.mubr.f32.mxu1 %v9356_v56 }
 0x150   :  { %5384 = vmatmul.mubr.f32.gmra.mrb[22].mxu0 %v9357_v35 }
 0x151   :  { %5864 = vmatmul.mubr.f32.gmra.mrb[22].mxu1 %v9357_v35  ;;  %5386 = vmatprep.mubr.f32.mxu0 %v9358_v63 }
 0x152   :  { %5866 = vmatprep.mubr.f32.mxu1 %v9358_v63 }
 0x154   :  { %5387 = vmatmul.mubr.f32.gmra.mrb[24].mxu0 %v9359_v23 }
 0x155   :  { %5867 = vmatmul.mubr.f32.gmra.mrb[24].mxu1 %v9359_v23  ;;  %5389 = vmatprep.mubr.f32.mxu0 %v9360_v11 }
 0x156   :  { %5869 = vmatprep.mubr.f32.mxu1 %v9360_v11 }
 0x158   :  { %5390 = vmatmul.mubr.f32.gmra.mrb[26].mxu0 %v9361_v42 }
 0x159   :  { %5870 = vmatmul.mubr.f32.gmra.mrb[26].mxu1 %v9361_v42  ;;  %5392 = vmatprep.mubr.f32.mxu0 %v9362_v6 }
 0x15a   :  { %5872 = vmatprep.mubr.f32.mxu1 %v9362_v6  ;;  %v8549_v6 = vld [vmem:[%s8795_s3] ss:$0 sm:$0xff]  ;;  %s7039_s3 = smov [#allocation9]  }
 0x15b   :  { %s4487_s8 = sshll.u32 %s7039_s3, 4  ;;  %s4488_s8 = int_to_ptr.vmem [resolvable:$true] %s4487_s8 }
 0x15c   :  { %5393 = vmatmul.mubr.f32.gmra.mrb[28].mxu0 %v9363_v32  ;;  %s7006_s9 = scalar_lea.vmem %s4488_s8, 256  ;;  %p7011_p11 = scmp.lt.s32.totalorder %s4488_s8, %s4488_s8 }
 0x15d   :  { %5873 = vmatmul.mubr.f32.gmra.mrb[28].mxu1 %v9363_v32  ;;  %5395 = vmatprep.mubr.f32.mxu0 %v9364_v53  ;;  %p7007_p10 = scmp.ne.s32.totalorder %s4488_s8, %s7006_s9  ;;  %p7012_p12 = scmp.lt.s32.totalorder %s7006_s9, %s7006_s9 }
 0x15e   :  { %5875 = vmatprep.mubr.f32.mxu1 %v9364_v53 }
 0x15f   :  { %p7013_p13 = por %p7012_p12, %p7011_p11 }
 0x160   :  { %5396 = vmatmul.mubr.f32.gmra.mrb[30].mxu0 %v8045_v62 }
 0x161   :  { %5876 = vmatmul.mubr.f32.gmra.mrb[30].mxu1 %v8045_v62  ;;  %5430 = vmatprep.mubr.f32.mxu0 %v7305_v36  ;;  %v9368_v62 = vld [vmem:[#allocation61_spill] sm:$0xff]  ;;  %p7014_p0 = pnand %p7013_p13, %p7007_p10 }
 0x162   :  { %5910 = vmatprep.mubr.f32.mxu1 %v7305_v36 }
 0x164   :  { %5431 = vmatmul.mubr.f32.vlgmr.msra.gmra.mrb[0].mxu0 %v9233_v46 }
 0x165   :  { %5911 = vmatmul.mubr.f32.vlgmr.msra.gmra.mrb[0].mxu1 %v9233_v46  ;;  %5433 = vmatprep.mubr.f32.mxu0 %v9234_v54 }
 0x166   :  { %6393 = vmatpush3.bf16.msra.mxu1 %v9248_v30  ;;  %5913 = vmatprep.mubr.f32.mxu1 %v9234_v54  ;;  %v9371_v30 = vld [vmem:[#allocation26_spill] sm:$0xff] }
 0x167   :  { %6395 = vmatprep.subr.bf16.mxu1 %v9260_v48  ;;  %6201 = vmatpush3.bf16.msra.mxu0 %v9250_v39  ;;  %v9369_v39 = vld [vmem:[#allocation23_spill] sm:$0xff] }
 0x168   :  { %5434 = vmatmul.mubr.f32.gmra.mrb[2].mxu0 %v9235_v43  ;;  %6203 = vmatprep.subr.bf16.mxu0 %v9262_v13 }
 0x169   :  { %5914 = vmatmul.mubr.f32.gmra.mrb[2].mxu1 %v9235_v43  ;;  %5436 = vmatprep.mubr.f32.mxu0 %v9236_v29 }
 0x16a   :  { %5916 = vmatprep.mubr.f32.mxu1 %v9236_v29  ;;  %6397 = vmatpush3.bf16.msra.mxu1 %v9260_v48  ;;  %v9365_v48 = vld [vmem:[#allocation21_spill] sm:$0xff] }
 0x16b   :  { %6399 = vmatprep.subr.bf16.mxu1 %v9264_v3  ;;  %6205 = vmatpush3.bf16.msra.mxu0 %v9262_v13  ;;  %v9367_v13 = vld [vmem:[#allocation24_spill] sm:$0xff] }
 0x16c   :  { %5437 = vmatmul.mubr.f32.gmra.mrb[4].mxu0 %v9237_v40  ;;  %6207 = vmatprep.subr.bf16.mxu0 %v9266_v37 }
 0x16d   :  { %5917 = vmatmul.mubr.f32.gmra.mrb[4].mxu1 %v9237_v40  ;;  %5439 = vmatprep.mubr.f32.mxu0 %v9238_v61 }
 0x16e   :  { %5919 = vmatprep.mubr.f32.mxu1 %v9238_v61  ;;  %6401 = vmatpush3.bf16.msra.mxu1 %v9264_v3  ;;  %v9372_v3 = vld [vmem:[#allocation64_spill] sm:$0xff] }
 0x16f   :  { %6403 = vmatprep.subr.bf16.mxu1 %v9268_v51  ;;  %6209 = vmatpush3.bf16.msra.mxu0 %v9266_v37  ;;  %v9366_v37 = vld [vmem:[#allocation59_spill] sm:$0xff] }
 0x170   :  { %5440 = vmatmul.mubr.f32.gmra.mrb[6].mxu0 %v9239_v1  ;;  %6211 = vmatprep.subr.bf16.mxu0 %v9270_v0 }
 0x171   :  { %5920 = vmatmul.mubr.f32.gmra.mrb[6].mxu1 %v9239_v1  ;;  %5442 = vmatprep.mubr.f32.mxu0 %v9240_v25 }
 0x172   :  { %5922 = vmatprep.mubr.f32.mxu1 %v9240_v25  ;;  %6405 = vmatpush3.bf16.msra.mxu1 %v9268_v51  ;;  %v9373_v51 = vld [vmem:[#allocation68_spill] sm:$0xff] }
 0x173   :  { %6407 = vmatprep.subr.bf16.mxu1 %v9272_v10  ;;  %6213 = vmatpush3.bf16.msra.mxu0 %v9270_v0  ;;  %v9370_v0 = vld [vmem:[#allocation63_spill] sm:$0xff] }
 0x174   :  { %5443 = vmatmul.mubr.f32.gmra.mrb[8].mxu0 %v9241_v60  ;;  %6215 = vmatprep.subr.bf16.mxu0 %v9365_v48 }
 0x175   :  { %5923 = vmatmul.mubr.f32.gmra.mrb[8].mxu1 %v9241_v60  ;;  %5445 = vmatprep.mubr.f32.mxu0 %v9366_v37 }
 0x176   :  { %5925 = vmatprep.mubr.f32.mxu1 %v9366_v37  ;;  %6409 = vmatpush3.bf16.msra.mxu1 %v9272_v10  ;;  %v9374_v10 = vld [vmem:[#allocation70_spill] sm:$0xff] }
 0x177   :  { %6411 = vmatprep.subr.bf16.mxu1 %v9367_v13  ;;  %6217 = vmatpush3.bf16.msra.mxu0 %v9365_v48 }
 0x178   :  { %5446 = vmatmul.mubr.f32.gmra.mrb[10].mxu0 %v9368_v62  ;;  %6219 = vmatprep.subr.bf16.mxu0 %v9369_v39 }
 0x179   :  { %5926 = vmatmul.mubr.f32.gmra.mrb[10].mxu1 %v9368_v62  ;;  %5448 = vmatprep.mubr.f32.mxu0 %v9370_v0 }
 0x17a   :  { %5928 = vmatprep.mubr.f32.mxu1 %v9370_v0  ;;  %6413 = vmatpush3.bf16.msra.mxu1 %v9367_v13 }
 0x17b   :  { %6415 = vmatprep.subr.bf16.mxu1 %v9371_v30  ;;  %6221 = vmatpush3.bf16.msra.mxu0 %v9369_v39 }
 0x17c   :  { %5449 = vmatmul.mubr.f32.gmra.mrb[12].mxu0 %v9372_v3  ;;  %6223 = vmatprep.subr.bf16.mxu0 %v9282_v2 }
 0x17d   :  { %5929 = vmatmul.mubr.f32.gmra.mrb[12].mxu1 %v9372_v3  ;;  %5451 = vmatprep.mubr.f32.mxu0 %v9373_v51 }
 0x17e   :  { %5931 = vmatprep.mubr.f32.mxu1 %v9373_v51  ;;  %6417 = vmatpush3.bf16.msra.mxu1 %v9371_v30 }
 0x17f   :  { %6419 = vmatprep.subr.bf16.mxu1 %v9284_v59  ;;  %6225 = vmatpush3.bf16.msra.mxu0 %v9282_v2  ;;  %v9378_v2 = vld [vmem:[#allocation85_spill] sm:$0xff] }
 0x180   :  { %5452 = vmatmul.mubr.f32.gmra.mrb[14].mxu0 %v9374_v10  ;;  %6227 = vmatprep.subr.bf16.mxu0 %v9288_v19 }
 0x181   :  { %5932 = vmatmul.mubr.f32.gmra.mrb[14].mxu1 %v9374_v10  ;;  %5454 = vmatprep.mubr.f32.mxu0 %v9375_v24 }
 0x182   :  { %5934 = vmatprep.mubr.f32.mxu1 %v9375_v24  ;;  %6421 = vmatpush3.bf16.msra.mxu1 %v9284_v59  ;;  %v9382_v59 = vld [vmem:[#allocation97_spill] sm:$0xff] }
 0x183   :  { %6229 = vmatpush3.bf16.msra.mxu0 %v9288_v19  ;;  %v9381_v19 = vld [vmem:[#allocation95_spill] sm:$0xff] }
 0x184   :  { %5455 = vmatmul.mubr.f32.gmra.mrb[16].mxu0 %v9376_v52 }
 0x185   :  { %5935 = vmatmul.mubr.f32.gmra.mrb[16].mxu1 %v9376_v52  ;;  %5457 = vmatprep.mubr.f32.mxu0 %v9377_v4 }
 0x186   :  { %5937 = vmatprep.mubr.f32.mxu1 %v9377_v4 }
 0x188   :  { %5458 = vmatmul.mubr.f32.gmra.mrb[18].mxu0 %v9378_v2 }
 0x189   :  { %5938 = vmatmul.mubr.f32.gmra.mrb[18].mxu1 %v9378_v2  ;;  %5460 = vmatprep.mubr.f32.mxu0 %v9379_v15 }
 0x18a   :  { %5940 = vmatprep.mubr.f32.mxu1 %v9379_v15 }
 0x18c   :  { %5461 = vmatmul.mubr.f32.gmra.mrb[20].mxu0 %v9380_v47 }
 0x18d   :  { %5941 = vmatmul.mubr.f32.gmra.mrb[20].mxu1 %v9380_v47  ;;  %5463 = vmatprep.mubr.f32.mxu0 %v9381_v19 }
 0x18e   :  { %5943 = vmatprep.mubr.f32.mxu1 %v9381_v19 }
 0x190   :  { %5464 = vmatmul.mubr.f32.gmra.mrb[22].mxu0 %v9382_v59 }
 0x191   :  { %5944 = vmatmul.mubr.f32.gmra.mrb[22].mxu1 %v9382_v59  ;;  %5466 = vmatprep.mubr.f32.mxu0 %v9383_v27 }
 0x192   :  { %5946 = vmatprep.mubr.f32.mxu1 %v9383_v27 }
 0x194   :  { %5467 = vmatmul.mubr.f32.gmra.mrb[24].mxu0 %v9384_v7 }
 0x195   :  { %5947 = vmatmul.mubr.f32.gmra.mrb[24].mxu1 %v9384_v7  ;;  %5469 = vmatprep.mubr.f32.mxu0 %v9385_v49 }
 0x196   :  { %5949 = vmatprep.mubr.f32.mxu1 %v9385_v49 }
 0x198   :  { %5470 = vmatmul.mubr.f32.gmra.mrb[26].mxu0 %v9386_v17 }
 0x199   :  { %5950 = vmatmul.mubr.f32.gmra.mrb[26].mxu1 %v9386_v17  ;;  %5472 = vmatprep.mubr.f32.mxu0 %v9387_v16 }
 0x19a   :  { %5952 = vmatprep.mubr.f32.mxu1 %v9387_v16 }
 0x19c   :  { %5473 = vmatmul.mubr.f32.gmra.mrb[28].mxu0 %v9388_v38 }
 0x19d   :  { %5953 = vmatmul.mubr.f32.gmra.mrb[28].mxu1 %v9388_v38  ;;  %5475 = vmatprep.mubr.f32.mxu0 %v9389_v31 }
 0x19e   :  { %5955 = vmatprep.mubr.f32.mxu1 %v9389_v31 }
 0x1a0   :  { %5476 = vmatmul.mubr.f32.gmra.mrb[30].mxu0 %v9390_v45 }
 0x1a1   :  { %5956 = vmatmul.mubr.f32.gmra.mrb[30].mxu1 %v9390_v45  ;;  %5510 = vmatprep.mubr.f32.mxu0 %v7305_v36 }
 0x1a2   :  { %5990 = vmatprep.mubr.f32.mxu1 %v7305_v36  ;;  %v8537_v36 = vld [vmem:[%s8796_s4] ss:$0 sm:$0xff] }
 0x1a4   :  { %5511 = vmatmul.mubr.f32.vlgmr.msra.gmra.mrb[0].mxu0 %v9233_v46 }
 0x1a5   :  { %5991 = vmatmul.mubr.f32.vlgmr.msra.gmra.mrb[0].mxu1 %v9233_v46  ;;  %5513 = vmatprep.mubr.f32.mxu0 %v9234_v54 }
 0x1a6   :  { %5993 = vmatprep.mubr.f32.mxu1 %v9234_v54 }
 0x1a8   :  { %5514 = vmatmul.mubr.f32.gmra.mrb[2].mxu0 %v9235_v43 }
 0x1a9   :  { %5994 = vmatmul.mubr.f32.gmra.mrb[2].mxu1 %v9235_v43  ;;  %5516 = vmatprep.mubr.f32.mxu0 %v9236_v29 }
 0x1aa   :  { %5996 = vmatprep.mubr.f32.mxu1 %v9236_v29 }
 0x1ac   :  { %5517 = vmatmul.mubr.f32.gmra.mrb[4].mxu0 %v9237_v40 }
 0x1ad   :  { %5997 = vmatmul.mubr.f32.gmra.mrb[4].mxu1 %v9237_v40  ;;  %5519 = vmatprep.mubr.f32.mxu0 %v9238_v61 }
 0x1ae   :  { %5999 = vmatprep.mubr.f32.mxu1 %v9238_v61 }
 0x1b0   :  { %5520 = vmatmul.mubr.f32.gmra.mrb[6].mxu0 %v9239_v1 }
 0x1b1   :  { %6000 = vmatmul.mubr.f32.gmra.mrb[6].mxu1 %v9239_v1  ;;  %5522 = vmatprep.mubr.f32.mxu0 %v9240_v25 }
 0x1b2   :  { %6002 = vmatprep.mubr.f32.mxu1 %v9240_v25 }
 0x1b4   :  { %5523 = vmatmul.mubr.f32.gmra.mrb[8].mxu0 %v9241_v60 }
 0x1b5   :  { %6003 = vmatmul.mubr.f32.gmra.mrb[8].mxu1 %v9241_v60  ;;  %5525 = vmatprep.mubr.f32.mxu0 %v9366_v37 }
 0x1b6   :  { %6005 = vmatprep.mubr.f32.mxu1 %v9366_v37 }
 0x1b8   :  { %5526 = vmatmul.mubr.f32.gmra.mrb[10].mxu0 %v9368_v62 }
 0x1b9   :  { %6006 = vmatmul.mubr.f32.gmra.mrb[10].mxu1 %v9368_v62  ;;  %5528 = vmatprep.mubr.f32.mxu0 %v9370_v0 }
 0x1ba   :  { %6008 = vmatprep.mubr.f32.mxu1 %v9370_v0 }
 0x1bc   :  { %5529 = vmatmul.mubr.f32.gmra.mrb[12].mxu0 %v9372_v3 }
 0x1bd   :  { %6009 = vmatmul.mubr.f32.gmra.mrb[12].mxu1 %v9372_v3  ;;  %5531 = vmatprep.mubr.f32.mxu0 %v9373_v51 }
 0x1be   :  { %6011 = vmatprep.mubr.f32.mxu1 %v9373_v51 }
 0x1c0   :  { %5532 = vmatmul.mubr.f32.gmra.mrb[14].mxu0 %v9374_v10 }
 0x1c1   :  { %6012 = vmatmul.mubr.f32.gmra.mrb[14].mxu1 %v9374_v10  ;;  %5534 = vmatprep.mubr.f32.mxu0 %v9375_v24 }
 0x1c2   :  { %6014 = vmatprep.mubr.f32.mxu1 %v9375_v24 }
 0x1c4   :  { %5535 = vmatmul.mubr.f32.gmra.mrb[16].mxu0 %v9376_v52 }
 0x1c5   :  { %6015 = vmatmul.mubr.f32.gmra.mrb[16].mxu1 %v9376_v52  ;;  %5537 = vmatprep.mubr.f32.mxu0 %v9377_v4 }
 0x1c6   :  { %6017 = vmatprep.mubr.f32.mxu1 %v9377_v4 }
 0x1c8   :  { %5538 = vmatmul.mubr.f32.gmra.mrb[18].mxu0 %v9378_v2 }
 0x1c9   :  { %6018 = vmatmul.mubr.f32.gmra.mrb[18].mxu1 %v9378_v2  ;;  %5540 = vmatprep.mubr.f32.mxu0 %v9379_v15 }
 0x1ca   :  { %6020 = vmatprep.mubr.f32.mxu1 %v9379_v15 }
 0x1cc   :  { %5541 = vmatmul.mubr.f32.gmra.mrb[20].mxu0 %v9380_v47 }
 0x1cd   :  { %6021 = vmatmul.mubr.f32.gmra.mrb[20].mxu1 %v9380_v47  ;;  %5543 = vmatprep.mubr.f32.mxu0 %v9381_v19 }
 0x1ce   :  { %6023 = vmatprep.mubr.f32.mxu1 %v9381_v19 }
 0x1d0   :  { %5544 = vmatmul.mubr.f32.gmra.mrb[22].mxu0 %v9382_v59 }
 0x1d1   :  { %6024 = vmatmul.mubr.f32.gmra.mrb[22].mxu1 %v9382_v59  ;;  %5546 = vmatprep.mubr.f32.mxu0 %v9383_v27 }
 0x1d2   :  { %6026 = vmatprep.mubr.f32.mxu1 %v9383_v27 }
 0x1d4   :  { %5547 = vmatmul.mubr.f32.gmra.mrb[24].mxu0 %v9384_v7 }
 0x1d5   :  { %6027 = vmatmul.mubr.f32.gmra.mrb[24].mxu1 %v9384_v7  ;;  %5549 = vmatprep.mubr.f32.mxu0 %v9385_v49 }
 0x1d6   :  { %6029 = vmatprep.mubr.f32.mxu1 %v9385_v49 }
 0x1d8   :  { %5550 = vmatmul.mubr.f32.gmra.mrb[26].mxu0 %v9386_v17 }
 0x1d9   :  { %6030 = vmatmul.mubr.f32.gmra.mrb[26].mxu1 %v9386_v17  ;;  %5552 = vmatprep.mubr.f32.mxu0 %v9387_v16 }
 0x1da   :  { %6032 = vmatprep.mubr.f32.mxu1 %v9387_v16 }
 0x1dc   :  { %5553 = vmatmul.mubr.f32.gmra.mrb[28].mxu0 %v9388_v38 }
 0x1dd   :  { %6033 = vmatmul.mubr.f32.gmra.mrb[28].mxu1 %v9388_v38  ;;  %5555 = vmatprep.mubr.f32.mxu0 %v9389_v31 }
 0x1de   :  { %6035 = vmatprep.mubr.f32.mxu1 %v9389_v31 }
 0x1e0   :  { %5556 = vmatmul.mubr.f32.gmra.mrb[30].mxu0 %v9390_v45 }
 0x1e1   :  { %6036 = vmatmul.mubr.f32.gmra.mrb[30].mxu1 %v9390_v45 }
 0x277   :  { %v5512_v46 = vpop.f32.mrb[0].mxu0 }
 0x278   :  { %v5992_v54 = vpop.f32.mrb[0].mxu1  ;;  %v1923_v43 = vpop.f32.mrb[1].mxu0  ;;  %v8553_v30 = vadd.f32 %v5512_v46, %v8549_v6 }
 0x279   :  { %v6454_v29 = vadd.f32 %v5992_v54, %v8537_v36  ;;  %v3904_v40 = vpop.f32.mrb[1].mxu1  ;;  %v8556_v3 = vadd.f32 %v8549_v6, %v1923_v43 }
 0x27a   :  { %v6455_v61 = vadd.f32 %v8537_v36, %v3904_v40 }
 0x27b   :  { %v4095_v1 = vsub.f32 0.0, %v6454_v29  ;;  %v5515_v25 = vpop.f32.mrb[2].mxu0 }
 0x27c   :  { %v4094_v60 = vsub.f32 0.0, %v6455_v61  ;;  %v5995_v33 = vpop.f32.mrb[2].mxu1  ;;  %v1935_v14 = vpop.f32.mrb[3].mxu0  ;;  %v8560_v2 = vadd.f32 %v5515_v25, %v8549_v6 }
 0x27d   :  { %v4128_v57 = vmul.f32 1.442695, %v4095_v1  ;;  %v6456_v21 = vadd.f32 %v5995_v33, %v8537_v36  ;;  %v3916_v28 = vpop.f32.mrb[3].mxu1  ;;  %v8564_v59 = vadd.f32 %v8549_v6, %v1935_v14 }
 0x27e   :  { %v4126_v26 = vmul.f32 1.442695, %v4094_v60  ;;  %v6457_v8 = vadd.f32 %v8537_v36, %v3916_v28 }
 0x27f   :  { %6812 = vpow2.f32 %v4128_v57  ;;  %v4097_v9 = vsub.f32 0.0, %v6456_v21  ;;  %v5518_v44 = vpop.f32.mrb[4].mxu0 }
 0x280   :  { %6814 = vpow2.f32 %v4126_v26  ;;  %v4096_v20 = vsub.f32 0.0, %v6457_v8  ;;  %v5998_v12 = vpop.f32.mrb[4].mxu1  ;;  %v1947_v5 = vpop.f32.mrb[5].mxu0  ;;  %v8567_v49 = vadd.f32 %v5518_v44, %v8549_v6 }
 0x281   :  { %v4132_v50 = vmul.f32 1.442695, %v4097_v9  ;;  %v6458_v18 = vadd.f32 %v5998_v12, %v8537_v36  ;;  %v3928_v34 = vpop.f32.mrb[5].mxu1  ;;  %v8570_v17 = vadd.f32 %v8549_v6, %v1947_v5 }
 0x282   :  { %v4130_v41 = vmul.f32 1.442695, %v4096_v20  ;;  %v6459_v55 = vadd.f32 %v8537_v36, %v3928_v34 }
 0x283   :  { %6816 = vpow2.f32 %v4132_v50  ;;  %v4099_v22 = vsub.f32 0.0, %v6458_v18  ;;  %v5521_v58 = vpop.f32.mrb[6].mxu0 }
 0x284   :  { %6818 = vpow2.f32 %v4130_v41  ;;  %v4098_v56 = vsub.f32 0.0, %v6459_v55  ;;  %v6001_v35 = vpop.f32.mrb[6].mxu1  ;;  %v1959_v63 = vpop.f32.mrb[7].mxu0  ;;  %v8573_v46 = vadd.f32 %v5521_v58, %v8549_v6 }
 0x285   :  { %v4136_v23 = vmul.f32 1.442695, %v4099_v22  ;;  %v6460_v11 = vadd.f32 %v6001_v35, %v8537_v36  ;;  %v3940_v42 = vpop.f32.mrb[7].mxu1  ;;  %v8578_v33 = vadd.f32 %v8549_v6, %v1959_v63 }
 0x286   :  { %v4134_v32 = vmul.f32 1.442695, %v4098_v56  ;;  %v6461_v53 = vadd.f32 %v8537_v36, %v3940_v42 }
 0x287   :  { %6820 = vpow2.f32 %v4136_v23  ;;  %v4101_v48 = vsub.f32 0.0, %v6460_v11  ;;  %v5524_v37 = vpop.f32.mrb[8].mxu0 }
 0x288   :  { %6822 = vpow2.f32 %v4134_v32  ;;  %v4100_v13 = vsub.f32 0.0, %v6461_v53  ;;  %v6004_v62 = vpop.f32.mrb[8].mxu1  ;;  %v1971_v39 = vpop.f32.mrb[9].mxu0  ;;  %v8581_v21 = vadd.f32 %v5524_v37, %v8549_v6 }
 0x289   :  { %v6813_v0 = vpop.eup %6812  ;;  %v4140_v51 = vmul.f32 1.442695, %v4101_v48  ;;  %v6462_v10 = vadd.f32 %v6004_v62, %v8537_v36  ;;  %v3952_v24 = vpop.f32.mrb[9].mxu1  ;;  %v8584_v28 = vadd.f32 %v8549_v6, %v1971_v39 }
 0x28a   :  { %v6815_v52 = vpop.eup %6814  ;;  %v4191_v4 = vadd.f32 1.0, %v6813_v0  ;;  %v4138_v15 = vmul.f32 1.442695, %v4100_v13  ;;  %v6463_v47 = vadd.f32 %v8537_v36, %v3952_v24 }
 0x28b   :  { %v4190_v19 = vadd.f32 1.0, %v6815_v52  ;;  %6824 = vpow2.f32 %v4140_v51  ;;  %v4103_v27 = vsub.f32 0.0, %v6462_v10  ;;  %v5527_v7 = vpop.f32.mrb[10].mxu0 }
 0x28c   :  { %6826 = vrcp.f32 %v4191_v4  ;;  %v4102_v16 = vsub.f32 0.0, %v6463_v47  ;;  %v6007_v38 = vpop.f32.mrb[10].mxu1  ;;  %v1983_v31 = vpop.f32.mrb[11].mxu0  ;;  %v8587_v20 = vadd.f32 %v5527_v7, %v8549_v6 }
 0x28d   :  { %v6817_v45 = vpop.eup %6816  ;;  %6828 = vrcp.f32 %v4190_v19  ;;  %v4144_v54 = vmul.f32 1.442695, %v4103_v27  ;;  %v6464_v43 = vadd.f32 %v6007_v38, %v8537_v36  ;;  %v3964_v29 = vpop.f32.mrb[11].mxu1  ;;  %v8592_v58 = vadd.f32 %v8549_v6, %v1983_v31 }
 0x28e   :  { %v6819_v40 = vpop.eup %6818  ;;  %v4193_v61 = vadd.f32 1.0, %v6817_v45  ;;  %6830 = vpow2.f32 %v4138_v15  ;;  %v4142_v1 = vmul.f32 1.442695, %v4102_v16  ;;  %v6465_v25 = vadd.f32 %v8537_v36, %v3964_v29 }
 0x28f   :  { %v4192_v60 = vadd.f32 1.0, %v6819_v40  ;;  %6832 = vpow2.f32 %v4144_v54  ;;  %v4105_v14 = vsub.f32 0.0, %v6464_v43  ;;  %v5530_v57 = vpop.f32.mrb[12].mxu0 }
 0x290   :  { %6834 = vrcp.f32 %v4193_v61  ;;  %v4104_v26 = vsub.f32 0.0, %v6465_v25  ;;  %v6010_v8 = vpop.f32.mrb[12].mxu1  ;;  %v1995_v9 = vpop.f32.mrb[13].mxu0  ;;  %v8595_v63 = vadd.f32 %v5530_v57, %v8549_v6 }
 0x291   :  { %v6821_v44 = vpop.eup %6820  ;;  %6836 = vrcp.f32 %v4192_v60  ;;  %v4148_v12 = vmul.f32 1.442695, %v4105_v14  ;;  %v6466_v5 = vadd.f32 %v6010_v8, %v8537_v36  ;;  %v3976_v50 = vpop.f32.mrb[13].mxu1  ;;  %v8598_v23 = vadd.f32 %v8549_v6, %v1995_v9 }
 0x292   :  { %v6823_v18 = vpop.eup %6822  ;;  %v4195_v34 = vadd.f32 1.0, %v6821_v44  ;;  %6838 = vpow2.f32 %v4142_v1  ;;  %v4146_v41 = vmul.f32 1.442695, %v4104_v26  ;;  %v6467_v55 = vadd.f32 %v8537_v36, %v3976_v50 }
 0x293   :  { %v4194_v22 = vadd.f32 1.0, %v6823_v18  ;;  %6840 = vpow2.f32 %v4148_v12  ;;  %v4107_v56 = vsub.f32 0.0, %v6466_v5  ;;  %v5533_v35 = vpop.f32.mrb[14].mxu0 }
 0x294   :  { %6842 = vrcp.f32 %v4195_v34  ;;  %v4106_v11 = vsub.f32 0.0, %v6467_v55  ;;  %v6013_v42 = vpop.f32.mrb[14].mxu1  ;;  %v2007_v32 = vpop.f32.mrb[15].mxu0  ;;  %v8601_v37 = vadd.f32 %v5533_v35, %v8549_v6 }
 0x295   :  { %v6825_v53 = vpop.eup %6824  ;;  %6844 = vrcp.f32 %v4194_v22  ;;  %v4152_v48 = vmul.f32 1.442695, %v4107_v56  ;;  %v6468_v13 = vadd.f32 %v6013_v42, %v8537_v36  ;;  %v3988_v62 = vpop.f32.mrb[15].mxu1  ;;  %v8607_v15 = vadd.f32 %v8549_v6, %v2007_v32 }
 0x296   :  { %v6827_v39 = vpop.eup %6826  ;;  %v4197_v0 = vadd.f32 1.0, %v6825_v53  ;;  %6846 = vpow2.f32 %v4146_v41  ;;  %v4150_v51 = vmul.f32 1.442695, %v4106_v11  ;;  %v6469_v10 = vadd.f32 %v8537_v36, %v3988_v62 }
 0x297   :  { %v6829_v24 = vpop.eup %6828  ;;  %v4287_v52 = vmul.f32 %v6827_v39, %v8553_v30  ;;  %6848 = vpow2.f32 %v4152_v48  ;;  %v4109_v4 = vsub.f32 0.0, %v6468_v13  ;;  %v5536_v47 = vpop.f32.mrb[16].mxu0 }
 0x298   :  { %v6831_v19 = vpop.eup %6830  ;;  %v4286_v27 = vmul.f32 %v6829_v24, %v8556_v3  ;;  %6850 = vrcp.f32 %v4197_v0  ;;  %v4108_v7 = vsub.f32 0.0, %v6469_v10  ;;  %v8611_v16 = vadd.f32 %v5536_v47, %v8549_v6  ;;  %v6016_v38 = vpop.f32.mrb[16].mxu1 }
 0x299   :  { %v2019_v31 = vpop.f32.mrb[17].mxu0  ;;  %v6833_v45 = vpop.eup %6832  ;;  %v4196_v54 = vadd.f32 1.0, %v6831_v19  ;;  %6852 = vpow2.f32 %v4150_v51  ;;  %v4156_v30 = vmul.f32 1.442695, %v4109_v4  ;;  %v6470_v43 = vadd.f32 %v6016_v38, %v8537_v36 }
 0x29a   :  { %v4000_v29 = vpop.f32.mrb[17].mxu1  ;;  %v6835_v40 = vpop.eup %6834  ;;  %v4320_v61 = vmax.f32 %v4286_v27, %v4287_v52  ;;  %v4199_v1 = vadd.f32 1.0, %v6833_v45  ;;  %v4154_v25 = vmul.f32 1.442695, %v4108_v7  ;;  %v8615_v3 = vadd.f32 %v8549_v6, %v2019_v31 }
 0x29b   :  { %v6837_v60 = vpop.eup %6836  ;;  %v4289_v14 = vmul.f32 %v6835_v40, %v8560_v2  ;;  %6854 = vrcp.f32 %v4196_v54  ;;  %v4111_v57 = vsub.f32 0.0, %v6470_v43  ;;  %v6471_v26 = vadd.f32 %v8537_v36, %v4000_v29  ;;  %v5539_v8 = vpop.f32.mrb[18].mxu0 }
 0x29c   :  { %v6839_v9 = vpop.eup %6838  ;;  %v4321_v44 = vrot.slane %v4320_v61, 4  ;;  %v4288_v12 = vmul.f32 %v6837_v60, %v8564_v59  ;;  %6856 = vrcp.f32 %v4199_v1  ;;  %v8621_v5 = vadd.f32 %v5539_v8, %v8549_v6  ;;  %v6019_v50 = vpop.f32.mrb[18].mxu1 }
 0x29d   :  { %v2031_v18 = vpop.f32.mrb[19].mxu0  ;;  %v6841_v34 = vpop.eup %6840  ;;  %v4198_v41 = vadd.f32 1.0, %v6839_v9  ;;  %6858 = vpow2.f32 %v4156_v30  ;;  %v4160_v55 = vmul.f32 1.442695, %v4111_v57  ;;  %v4110_v2 = vsub.f32 0.0, %v6471_v26 }
 0x29e   :  { %v4012_v22 = vpop.f32.mrb[19].mxu1  ;;  %v6843_v56 = vpop.eup %6842  ;;  %v4322_v35 = vmax.f32 %v4320_v61, %v4321_v44  ;;  %v4327_v11 = vmax.f32 %v4288_v12, %v4289_v14  ;;  %v4201_v42 = vadd.f32 1.0, %v6841_v34  ;;  %6860 = vpow2.f32 %v4154_v25 }
 0x29f   :  { %v6845_v32 = vpop.eup %6844  ;;  %v4291_v59 = vmul.f32 %v6843_v56, %v8567_v49  ;;  %6862 = vrcp.f32 %v4198_v41  ;;  %v4158_v53 = vmul.f32 1.442695, %v4110_v2  ;;  %v6472_v48 = vadd.f32 %v6019_v50, %v8537_v36  ;;  %v5542_v13 = vpop.f32.mrb[20].mxu0 }
 0x2a0   :  { %v6847_v62 = vpop.eup %6846  ;;  %v4323_v39 = vrot.slane %v4322_v35, 2  ;;  %v4328_v0 = vrot.slane %v4327_v11, 4  ;;  %v4290_v51 = vmul.f32 %v6845_v32, %v8570_v17  ;;  %6864 = vrcp.f32 %v4201_v42  ;;  %v6022_v10 = vpop.f32.mrb[20].mxu1 }
 0x2a1   :  { %v2043_v24 = vpop.f32.mrb[21].mxu0  ;;  %v6849_v52 = vpop.eup %6848  ;;  %v4200_v4 = vadd.f32 1.0, %v6847_v62  ;;  %6866 = vpow2.f32 %v4160_v55  ;;  %v4113_v47 = vsub.f32 0.0, %v6472_v48  ;;  %v8627_v19 = vadd.f32 %v8549_v6, %v2031_v18 }
 0x2a2   :  { %v4024_v49 = vpop.f32.mrb[21].mxu1  ;;  %v6851_v27 = vpop.eup %6850  ;;  %v8629_v7 = vmax.f32 %v4322_v35, %v4323_v39  ;;  %v4329_v38 = vmax.f32 %v4327_v11, %v4328_v0  ;;  %v4334_v31 = vmax.f32 %v4290_v51, %v4291_v59  ;;  %v4203_v45 = vadd.f32 1.0, %v6849_v52 }
 0x2a3   :  { %v6853_v54 = vpop.eup %6852  ;;  %v4293_v17 = vmul.f32 %v6851_v27, %v8573_v46  ;;  %6868 = vrcp.f32 %v4200_v4  ;;  %v4164_v30 = vmul.f32 1.442695, %v4113_v47  ;;  %v6473_v43 = vadd.f32 %v8537_v36, %v4012_v22  ;;  %v5545_v29 = vpop.f32.mrb[22].mxu0 }
 0x2a4   :  { %v4325_v40 = vrot.slane %v8629_v7, 1  ;;  %v4330_v61 = vrot.slane %v4329_v38, 2  ;;  %v4335_v1 = vrot.slane %v4334_v31, 4  ;;  %6870 = vrcp.f32 %v4203_v45  ;;  %v6025_v25 = vpop.f32.mrb[22].mxu1  ;;  %v2055_v60 = vpop.f32.mrb[23].mxu0 }
 0x2a5   :  { %v6855_v14 = vpop.eup %6854  ;;  %v4202_v57 = vadd.f32 1.0, %v6853_v54  ;;  %6872 = vpow2.f32 %v4158_v53  ;;  %v4112_v26 = vsub.f32 0.0, %v6473_v43  ;;  %v8635_v8 = vadd.f32 %v5542_v13, %v8549_v6  ;;  %v4036_v46 = vpop.f32.mrb[23].mxu1 }
 0x2a6   :  { %v6857_v9 = vpop.eup %6856  ;;  %v8637_v44 = vmax.f32 %v4329_v38, %v4330_v61  ;;  %v8639_v12 = vmax.f32 %v4334_v31, %v4335_v1  ;;  %v4292_v50 = vmul.f32 %v6855_v14, %v8578_v33  ;;  %6874 = vpow2.f32 %v4164_v30 }
 0x2a7   :  { %v6859_v18 = vpop.eup %6858  ;;  %v4295_v34 = vmul.f32 %v6857_v9, %v8581_v21  ;;  %6876 = vrcp.f32 %v4202_v57  ;;  %v4162_v41 = vmul.f32 1.442695, %v4112_v26  ;;  %v6474_v55 = vadd.f32 %v6022_v10, %v8537_v36  ;;  %v5548_v2 = vpop.f32.mrb[24].mxu0 }
 0x2a8   :  { %v6861_v22 = vpop.eup %6860  ;;  %v4332_v56 = vrot.slane %v8637_v44, 1  ;;  %v4337_v35 = vrot.slane %v8639_v12, 2  ;;  %v4341_v11 = vmax.f32 %v4292_v50, %v4293_v17  ;;  %v4205_v42 = vadd.f32 1.0, %v6859_v18  ;;  %v6028_v32 = vpop.f32.mrb[24].mxu1 }
 0x2a9   :  { %v2067_v59 = vpop.f32.mrb[25].mxu0  ;;  %v6863_v53 = vpop.eup %6862  ;;  %v4204_v33 = vadd.f32 1.0, %v6861_v22  ;;  %6878 = vpow2.f32 %v4162_v41  ;;  %v4115_v48 = vsub.f32 0.0, %v6474_v55  ;;  %v8647_v21 = vadd.f32 %v8549_v6, %v2043_v24 }
 0x2aa   :  { %v4048_v13 = vpop.f32.mrb[25].mxu1  ;;  %v6865_v62 = vpop.eup %6864  ;;  %v4342_v39 = vrot.slane %v4341_v11, 4  ;;  %v4294_v0 = vmul.f32 %v6863_v53, %v8584_v28  ;;  %6880 = vrcp.f32 %v4205_v42  ;;  %v6475_v51 = vadd.f32 %v8537_v36, %v4024_v49 }
 0x2ab   :  { %v6867_v10 = vpop.eup %6866  ;;  %v4297_v52 = vmul.f32 %v6865_v62, %v8587_v20  ;;  %6882 = vrcp.f32 %v4204_v33  ;;  %v4168_v4 = vmul.f32 1.442695, %v4115_v48  ;;  %v8653_v47 = vadd.f32 %v5545_v29, %v8549_v6  ;;  %v5551_v27 = vpop.f32.mrb[26].mxu0 }
 0x2ac   :  { %v8655_v38 = vmax.f32 %v4341_v11, %v4342_v39  ;;  %v8657_v24 = vmax.f32 %v4294_v0, %v4295_v34  ;;  %v4207_v31 = vadd.f32 1.0, %v6867_v10  ;;  %v4114_v45 = vsub.f32 0.0, %v6475_v51  ;;  %v6031_v54 = vpop.f32.mrb[26].mxu1  ;;  %v2079_v28 = vpop.f32.mrb[27].mxu0 }
 0x2ad   :  { %v6869_v17 = vpop.eup %6868  ;;  %6884 = vpow2.f32 %v4168_v4  ;;  %v6476_v49 = vadd.f32 %v6025_v25, %v8537_v36  ;;  %v8661_v20 = vadd.f32 %v8549_v6, %v2055_v60  ;;  %v6477_v30 = vadd.f32 %v8537_v36, %v4036_v46  ;;  %v4060_v43 = vpop.f32.mrb[27].mxu1 }
 0x2ae   :  { %v6871_v29 = vpop.eup %6870  ;;  %v4349_v61 = vrot.slane %v8657_v24, 4  ;;  %v4296_v1 = vmul.f32 %v6869_v17, %v8592_v58  ;;  %6886 = vrcp.f32 %v4207_v31  ;;  %v4166_v14 = vmul.f32 1.442695, %v4114_v45 }
 0x2af   :  { %v6873_v57 = vpop.eup %6872  ;;  %v8667_v26 = vmul.f32 %v6871_v29, %v8595_v63  ;;  %v4117_v9 = vsub.f32 0.0, %v6476_v49  ;;  %v4116_v50 = vsub.f32 0.0, %v6477_v30  ;;  %v8670_v25 = vadd.f32 %v5548_v2, %v8549_v6  ;;  %v5554_v60 = vpop.f32.mrb[28].mxu0 }
 0x2b0   :  { %v6875_v18 = vpop.eup %6874  ;;  %v8672_v46 = vmax.f32 %v4296_v1, %v4297_v52  ;;  %v4206_v34 = vadd.f32 1.0, %v6873_v57  ;;  %6888 = vpow2.f32 %v4166_v14  ;;  %v6478_v41 = vadd.f32 %v6028_v32, %v8537_v36  ;;  %v6034_v58 = vpop.f32.mrb[28].mxu1 }
 0x2b1   :  { %v2091_v55 = vpop.f32.mrb[29].mxu0  ;;  %v6877_v22 = vpop.eup %6876  ;;  %v4209_v11 = vadd.f32 1.0, %v6875_v18  ;;  %v4172_v42 = vmul.f32 1.442695, %v4117_v9  ;;  %v4170_v63 = vmul.f32 1.442695, %v4116_v50  ;;  %v8676_v53 = vadd.f32 %v8549_v6, %v2067_v59 }
 0x2b2   :  { %v4072_v33 = vpop.f32.mrb[29].mxu1  ;;  %v8679_v2 = vmul.f32 %v6877_v22, %v8598_v23  ;;  %6890 = vrcp.f32 %v4206_v34  ;;  %v4119_v48 = vsub.f32 0.0, %v6478_v41  ;;  %v6479_v62 = vadd.f32 %v8537_v36, %v4048_v13 }
 0x2b3   :  { %v6879_v39 = vpop.eup %6878  ;;  %6892 = vrcp.f32 %v4209_v11  ;;  %v8683_v32 = vadd.f32 %v5551_v27, %v8549_v6  ;;  %v6480_v0 = vadd.f32 %v6031_v54, %v8537_v36  ;;  %v8687_v51 = vadd.f32 %v8549_v6, %v2079_v28  ;;  %v5557_v59 = vpop.f32.mrb[30].mxu0 }
 0x2b4   :  { %v6881_v10 = vpop.eup %6880  ;;  %v4208_v52 = vadd.f32 1.0, %v6879_v39  ;;  %6894 = vpow2.f32 %v4172_v42  ;;  %v4176_v23 = vmul.f32 1.442695, %v4119_v48  ;;  %v4118_v4 = vsub.f32 0.0, %v6479_v62  ;;  %v6037_v31 = vpop.f32.mrb[30].mxu1 }
 0x2b5   :  { %v2103_v45 = vpop.f32.mrb[31].mxu0  ;;  %v6883_v17 = vpop.eup %6882  ;;  %v8690_v13 = vmul.f32 %v6881_v10, %v8601_v37  ;;  %6896 = vpow2.f32 %v4170_v63  ;;  %v4121_v27 = vsub.f32 0.0, %v6480_v0  ;;  %v6481_v49 = vadd.f32 %v8537_v36, %v4060_v43 }
 0x2b6   :  { %v4084_v54 = vpop.f32.mrb[31].mxu1  ;;  %v8694_v28 = vmul.f32 %v6883_v17, %v8607_v15  ;;  %6898 = vrcp.f32 %v4208_v52  ;;  %v4174_v30 = vmul.f32 1.442695, %v4118_v4  ;;  %v8697_v29 = vadd.f32 %v5554_v60, %v8549_v6 }
 0x2b7   :  { %v6885_v1 = vpop.eup %6884  ;;  %6900 = vpow2.f32 %v4176_v23  ;;  %v4180_v14 = vmul.f32 1.442695, %v4121_v27  ;;  %v4120_v57 = vsub.f32 0.0, %v6481_v49  ;;  %v6482_v37 = vadd.f32 %v6034_v58, %v8537_v36 }
 0x2b8   :  { %v6887_v9 = vpop.eup %6886  ;;  %v4211_v50 = vadd.f32 1.0, %v6885_v1  ;;  %6902 = vpow2.f32 %v4174_v30  ;;  %v8701_v43 = vadd.f32 %v8549_v6, %v2091_v55  ;;  %v6483_v15 = vadd.f32 %v8537_v36, %v4072_v33 }
 0x2b9   :  { %v4303_v18 = vmul.f32 %v6887_v9, %v8611_v16  ;;  %6904 = vpow2.f32 %v4180_v14  ;;  %v4178_v34 = vmul.f32 1.442695, %v4120_v57  ;;  %v4123_v60 = vsub.f32 0.0, %v6482_v37 }
 0x2ba   :  { %v6889_v41 = vpop.eup %6888  ;;  %6906 = vrcp.f32 %v4211_v50  ;;  %v4122_v22 = vsub.f32 0.0, %v6483_v15  ;;  %v8706_v11 = vadd.f32 %v5557_v59, %v8549_v6  ;;  %v6484_v58 = vadd.f32 %v6037_v31, %v8537_v36 }
 0x2bb   :  { %v4210_v42 = vadd.f32 1.0, %v6889_v41  ;;  %6908 = vpow2.f32 %v4178_v34  ;;  %v4184_v63 = vmul.f32 1.442695, %v4123_v60  ;;  %v8710_v55 = vadd.f32 %v8549_v6, %v2103_v45 }
 0x2bc   :  { %v6891_v33 = vpop.eup %6890  ;;  %v4182_v48 = vmul.f32 1.442695, %v4122_v22  ;;  %v4125_v16 = vsub.f32 0.0, %v6484_v58  ;;  %v6485_v62 = vadd.f32 %v8537_v36, %v4084_v54  ;;  %v8716_v39 = vmax.f32 %v8629_v7, %v4325_v40 }
 0x2bd   :  { %v6893_v0 = vpop.eup %6892  ;;  %v4302_v59 = vmul.f32 %v6891_v33, %v8615_v3  ;;  %6910 = vrcp.f32 %v4210_v42  ;;  %v8722_v10 = vmax.f32 %v8637_v44, %v4332_v56  ;;  %v4338_v6 = vmax.f32 %v8639_v12, %v4337_v35 }
 0x2be   :  { %v6895_v52 = vpop.eup %6894  ;;  %v4305_v36 = vmul.f32 %v6893_v0, %v8621_v5  ;;  %6912 = vpow2.f32 %v4184_v63  ;;  %v4188_v23 = vmul.f32 1.442695, %v4125_v16  ;;  %v4124_v7 = vsub.f32 0.0, %v6485_v62 }
 0x2bf   :  { %v6897_v40 = vpop.eup %6896  ;;  %v4376_v4 = vmax.f32 %v4302_v59, %v4303_v18  ;;  %v4213_v31 = vadd.f32 1.0, %v6895_v52  ;;  %6914 = vpow2.f32 %v4182_v48  ;;  %v4339_v3 = vrot.slane %v4338_v6, 1 }
 0x2c0   :  { %v6899_v45 = vpop.eup %6898  ;;  %v4212_v17 = vadd.f32 1.0, %v6897_v40  ;;  %6916 = vpow2.f32 %v4188_v23  ;;  %v4186_v44 = vmul.f32 1.442695, %v4124_v7  ;;  %v4344_v56 = vrot.slane %v8655_v38, 2 }
 0x2c1   :  { %v6901_v27 = vpop.eup %6900  ;;  %v4377_v49 = vrot.slane %v4376_v4, 4  ;;  %v4304_v12 = vmul.f32 %v6899_v45, %v8627_v19  ;;  %6918 = vrcp.f32 %v4213_v31  ;;  %v8730_v5 = vmax.f32 %v4338_v6, %v4339_v3 }
 0x2c2   :  { %v6903_v35 = vpop.eup %6902  ;;  %6920 = vrcp.f32 %v4212_v17  ;;  %v4215_v54 = vadd.f32 1.0, %v6901_v27  ;;  %v4345_v30 = vmax.f32 %v8655_v38, %v4344_v56  ;;  %v4350_v1 = vmax.f32 %v8657_v24, %v4349_v61 }
 0x2c3   :  { %v6905_v14 = vpop.eup %6904  ;;  %v4378_v57 = vmax.f32 %v4376_v4, %v4377_v49  ;;  %v4383_v37 = vmax.f32 %v4304_v12, %v4305_v36  ;;  %v4214_v9 = vadd.f32 1.0, %v6903_v35  ;;  %6922 = vpow2.f32 %v4186_v44 }
 0x2c4   :  { %v6907_v50 = vpop.eup %6906  ;;  %6924 = vrcp.f32 %v4215_v54  ;;  %v4217_v19 = vadd.f32 1.0, %v6905_v14  ;;  %v4346_v15 = vrot.slane %v4345_v30, 1  ;;  %v4351_v18 = vrot.slane %v4350_v1, 2 }
 0x2c5   :  { %v6909_v34 = vpop.eup %6908  ;;  %v4379_v60 = vrot.slane %v4378_v57, 2  ;;  %v4384_v41 = vrot.slane %v4383_v37, 4  ;;  %v4307_v22 = vmul.f32 %v6907_v50, %v8635_v8  ;;  %6926 = vrcp.f32 %v4214_v9 }
 0x2c6   :  { %6928 = vrcp.f32 %v4217_v19  ;;  %v4216_v38 = vadd.f32 1.0, %v6909_v34  ;;  %v8737_v58 = vmax.f32 %v4345_v30, %v4346_v15  ;;  %v4352_v24 = vmax.f32 %v4350_v1, %v4351_v18 }
 0x2c7   :  { %v6911_v61 = vpop.eup %6910  ;;  %v4380_v42 = vmax.f32 %v4378_v57, %v4379_v60  ;;  %v4385_v63 = vmax.f32 %v4383_v37, %v4384_v41  ;;  %v4356_v33 = vrot.slane %v8672_v46, 4  ;;  %v4362_v48 = vmax.f32 %v8679_v2, %v8667_v26 }
 0x2c8   :  { %v6913_v16 = vpop.eup %6912  ;;  %v4306_v62 = vmul.f32 %v6911_v61, %v8647_v21  ;;  %6930 = vrcp.f32 %v4216_v38  ;;  %v4353_v0 = vrot.slane %v4352_v24, 1  ;;  %v4369_v8 = vmax.f32 %v8694_v28, %v8690_v13 }
 0x2c9   :  { %v6915_v59 = vpop.eup %6914  ;;  %v4381_v6 = vrot.slane %v4380_v42, 1  ;;  %v4386_v52 = vrot.slane %v4385_v63, 2  ;;  %v4219_v36 = vadd.f32 1.0, %v6913_v16  ;;  %v4357_v23 = vmax.f32 %v8672_v46, %v4356_v33 }
 0x2ca   :  { %v6917_v7 = vpop.eup %6916  ;;  %v4390_v40 = vmax.f32 %v4306_v62, %v4307_v22  ;;  %v4218_v4 = vadd.f32 1.0, %v6915_v59  ;;  %v8746_v26 = vmax.f32 %v4352_v24, %v4353_v0  ;;  %v4363_v2 = vrot.slane %v4362_v48, 4 }
 0x2cb   :  { %v6919_v21 = vpop.eup %6918  ;;  %v4387_v31 = vmax.f32 %v4385_v63, %v4386_v52  ;;  %6932 = vrcp.f32 %v4219_v36  ;;  %v4221_v3 = vadd.f32 1.0, %v6917_v7  ;;  %v4358_v13 = vrot.slane %v4357_v23, 2 }
 0x2cc   :  { %v6921_v28 = vpop.eup %6920  ;;  %v4391_v45 = vrot.slane %v4390_v40, 4  ;;  %v4309_v17 = vmul.f32 %v6919_v21, %v8653_v47  ;;  %6934 = vrcp.f32 %v4218_v4  ;;  %v4364_v46 = vmax.f32 %v4362_v48, %v4363_v2 }
 0x2cd   :  { %v6923_v44 = vpop.eup %6922  ;;  %v4388_v56 = vrot.slane %v4387_v31, 1  ;;  %v4308_v27 = vmul.f32 %v6921_v28, %v8661_v20  ;;  %6936 = vrcp.f32 %v4221_v3  ;;  %v4359_v49 = vmax.f32 %v4357_v23, %v4358_v13 }
 0x2ce   :  { %v6925_v12 = vpop.eup %6924  ;;  %v4392_v35 = vmax.f32 %v4390_v40, %v4391_v45  ;;  %v4220_v54 = vadd.f32 1.0, %v6923_v44  ;;  %v4365_v30 = vrot.slane %v4364_v46, 2  ;;  %v4370_v1 = vrot.slane %v4369_v8, 4 }
 0x2cf   :  { %v6927_v14 = vpop.eup %6926  ;;  %v4397_v57 = vmax.f32 %v4308_v27, %v4309_v17  ;;  %v4311_v37 = vmul.f32 %v6925_v12, %v8670_v25  ;;  %v4360_v9 = vrot.slane %v4359_v49, 1  ;;  %v4382_v47 = vmax.f32 %v4380_v42, %v4381_v6 }
 0x2d0   :  { %v6929_v50 = vpop.eup %6928  ;;  %v4393_v19 = vrot.slane %v4392_v35, 2  ;;  %v4310_v15 = vmul.f32 %v6927_v14, %v8676_v53  ;;  %6938 = vrcp.f32 %v4220_v54  ;;  %v4366_v20 = vmax.f32 %v4364_v46, %v4365_v30 }
 0x2d1   :  { %v4398_v18 = vrot.slane %v4397_v57, 4  ;;  %v4313_v34 = vmul.f32 %v6929_v50, %v8683_v32  ;;  %v4361_v60 = vmax.f32 %v4359_v49, %v4360_v9  ;;  %v4371_v41 = vmax.f32 %v4369_v8, %v4370_v1 }
 0x2d2   :  { %v6931_v22 = vpop.eup %6930  ;;  %v4404_v38 = vmax.f32 %v4310_v15, %v4311_v37  ;;  %v4367_v24 = vrot.slane %v4366_v20, 1  ;;  %v4389_v61 = vmax.f32 %v4387_v31, %v4388_v56  ;;  %v4394_v25 = vmax.f32 %v4392_v35, %v4393_v19 }
 0x2d3   :  { %v4399_v63 = vmax.f32 %v4397_v57, %v4398_v18  ;;  %v4312_v42 = vmul.f32 %v6931_v22, %v8687_v51  ;;  %v4372_v33 = vrot.slane %v4371_v41, 2  ;;  %v4449_v53 = vsel %vm4448_vm0, %v8722_v10, %v8716_v39 }
 0x2d4   :  { %v4405_v48 = vrot.slane %v4404_v38, 4  ;;  %v4368_v16 = vmax.f32 %v4366_v20, %v4367_v24  ;;  %v4395_v62 = vrot.slane %v4394_v25, 1  ;;  %v4451_v32 = vsel %vm4450_vm1, %v8730_v5, %v4449_v53 }
 0x2d5   :  { %v6933_v0 = vpop.eup %6932  ;;  %v4411_v8 = vmax.f32 %v4312_v42, %v4313_v34  ;;  %v4373_v59 = vmax.f32 %v4371_v41, %v4372_v33  ;;  %v4400_v6 = vrot.slane %v4399_v63, 2  ;;  %v4453_v52 = vsel %vm4452_vm2, %v8737_v58, %v4451_v32 }
 0x2d6   :  { %v6935_v36 = vpop.eup %6934  ;;  %v4315_v51 = vmul.f32 %v6933_v0, %v8697_v29  ;;  %v4396_v23 = vmax.f32 %v4394_v25, %v4395_v62  ;;  %v4406_v7 = vmax.f32 %v4404_v38, %v4405_v48  ;;  %v4455_v39 = vsel %vm4454_vm3, %v8746_v26, %v4453_v52 }
 0x2d7   :  { %v6937_v10 = vpop.eup %6936  ;;  %v4314_v40 = vmul.f32 %v6935_v36, %v8701_v43  ;;  %v4374_v4 = vrot.slane %v4373_v59, 1  ;;  %v4401_v5 = vmax.f32 %v4399_v63, %v4400_v6  ;;  %v4412_v2 = vrot.slane %v4411_v8, 4 }
 0x2d8   :  { %v4317_v21 = vmul.f32 %v6937_v10, %v8706_v11  ;;  %v4407_v31 = vrot.slane %v4406_v7, 2  ;;  %v4457_v3 = vsel %vm4456_vm4, %v4361_v60, %v4455_v39  ;;  %v4462_v58 = vsel %vm4448_vm0, %v4389_v61, %v4382_v47 }
 0x2d9   :  { %v4375_v13 = vmax.f32 %v4373_v59, %v4374_v4  ;;  %v4402_v29 = vrot.slane %v4401_v5, 1  ;;  %v4413_v28 = vmax.f32 %v4411_v8, %v4412_v2  ;;  %v4418_v45 = vmax.f32 %v4314_v40, %v4315_v51 }
 0x2da   :  { %v6939_v17 = vpop.eup %6938  ;;  %v4408_v46 = vmax.f32 %v4406_v7, %v4407_v31  ;;  %v4459_v26 = vsel %vm4458_vm5, %v4368_v16, %v4457_v3  ;;  %v4463_v43 = vsel %vm4450_vm1, %v4396_v23, %v4462_v58 }
 0x2db   :  { %v4316_v44 = vmul.f32 %v6939_v17, %v8710_v55  ;;  %v4403_v56 = vmax.f32 %v4401_v5, %v4402_v29  ;;  %v4414_v27 = vrot.slane %v4413_v28, 2  ;;  %v4419_v11 = vrot.slane %v4418_v45, 4 }
 0x2dc   :  { %v4409_v49 = vrot.slane %v4408_v46, 1  ;;  %v4461_v12 = vsel %vm4460_vm6, %v4375_v13, %v4459_v26 }
 0x2dd   :  { %v4415_v35 = vmax.f32 %v4413_v28, %v4414_v27  ;;  %v4420_v54 = vmax.f32 %v4418_v45, %v4419_v11  ;;  %v4425_v30 = vmax.f32 %v4316_v44, %v4317_v21  ;;  %v4464_v1 = vsel %vm4452_vm2, %v4403_v56, %v4463_v43  ;;  %4480 = vst [vmem:[#allocation9] sm:$0xff] %v4461_v12 }
 0x2de   :  { %v4410_v14 = vmax.f32 %v4408_v46, %v4409_v49 }
 0x2df   :  { %v4416_v57 = vrot.slane %v4415_v35, 1  ;;  %v4421_v37 = vrot.slane %v4420_v54, 2  ;;  %v4426_v9 = vrot.slane %v4425_v30, 4 }
 0x2e0   :  { %v4465_v47 = vsel %vm4454_vm3, %v4410_v14, %v4464_v1 }
 0x2e1   :  { %v4417_v50 = vmax.f32 %v4415_v35, %v4416_v57  ;;  %v4422_v55 = vmax.f32 %v4420_v54, %v4421_v37  ;;  %v4427_v19 = vmax.f32 %v4425_v30, %v4426_v9 }
 0x2e3   :  { %v4423_v15 = vrot.slane %v4422_v55, 1  ;;  %v4428_v20 = vrot.slane %v4427_v19, 2  ;;  %v4466_v18 = vsel %vm4456_vm4, %v4417_v50, %v4465_v47 }
 0x2e5   :  { %v4424_v34 = vmax.f32 %v4422_v55, %v4423_v15  ;;  %v4429_v60 = vmax.f32 %v4427_v19, %v4428_v20 }
 0x2e7   :  { %v4430_v41 = vrot.slane %v4429_v60, 1  ;;  %v4467_v22 = vsel %vm4458_vm5, %v4424_v34, %v4466_v18 }
 0x2e9   :  { %v4431_v38 = vmax.f32 %v4429_v60, %v4430_v41 }
 0x2eb   :  { %v4468_v24 = vsel %vm4460_vm6, %v4431_v38, %v4467_v22 }
 0x2ec   :  { %4481 = vst [vmem:[#allocation9 + $0x8] sm:$0xff] %v4468_v24 }
 0x2ed   :  { %7017 = shalt.err (!%p7014_p0)
}
 0x2ee   :  { %s7018_s12 = scalar_lea.hbm %s8797_s5, 256 }
 0x2ef   :  { %p7019_p1 = scmp.ne.s32.totalorder %s8797_s5, %s7018_s12  ;;  %p7022_p2 = scmp.lt.u32.totalorder %s7018_s12, %s8797_s5 }
 0x2f1   :  { %p7024_p3 = pnand %p7022_p2, %p7019_p1 }
 0x2f3   :  { %7027 = shalt.err (!%p7024_p3)
}
 0x2f4   :  { %4493 = dma.vmem_to_hbm [thread:$0]  %s4488_s8, 256, %s8797_s5, [#allocation5], %s7036_s30, %s7036_s30, %s7037_s6  }
 0x2f5   :  { %7032 = dma.done.wait [#allocation5], 256  }
 0x2f6   :  { %7033 = vsyncadd [#allocation5], 4294967040 }
 0x2f7   :  { %4497 = vsyncpa [#allocation4], 1 }
 0x2f8   :  { %4498 = vsyncpa [#allocation7], 1 }
 0x2f9   :  { %4499 = vsyncpa [#allocation5], 1 }

</bundles_post_ra>
